<compile_context>
chip_gen: v5e
topology: v5e:2x2
jax: 0.10.0
libtpu: 0.0.40
codegen_flags: <defaults>
</compile_context>

<pallas_src>
import jax
import jax.numpy as jnp
from jax.experimental import pallas as pl
from jax.experimental.pallas import tpu as pltpu


def _round_up(a, b):
    return (a + b - 1) // b * b


# ---------------------------------------------------------------------------
# Fused single-shot kernel: everything resident in VMEM, single invocation.
# ---------------------------------------------------------------------------
def _ngcf_fused_kernel(adj_ref, x_ref, wgc_ref, bgc_ref, wbi_ref, bbi_ref, o_ref):
    adj = adj_ref[...]
    side = jnp.dot(adj, x_ref[...], preferred_element_type=jnp.float32)
    bi = jnp.dot(adj, side.astype(adj.dtype), preferred_element_type=jnp.float32)
    sum_emb = (
        jnp.dot(side, wgc_ref[...], preferred_element_type=jnp.float32) + bgc_ref[...]
    )
    bi_emb = (
        jnp.dot(bi, wbi_ref[...], preferred_element_type=jnp.float32) + bbi_ref[...]
    )
    o_ref[...] = (sum_emb + bi_emb).astype(o_ref.dtype)


def _ngcf_fused(adj, x, w_gc, b_gc, w_bi, b_bi, out_dtype):
    n = adj.shape[0]
    f_out = w_gc.shape[1]
    return pl.pallas_call(
        _ngcf_fused_kernel,
        out_shape=jax.ShapeDtypeStruct((n, f_out), out_dtype),
        compiler_params=pltpu.CompilerParams(vmem_limit_bytes=32 * 1024 * 1024),
    )(adj, x, w_gc, b_gc, w_bi, b_bi)


# ---------------------------------------------------------------------------
# Tiled fallback for graphs that do not fit in VMEM.
# ---------------------------------------------------------------------------
def _spmm_kernel(adj_ref, x_ref, o_ref):
    # grid = (row tiles, K tiles); reduction (K) is the last grid axis.
    # Output block index is constant across K -> o_ref stays VMEM-resident,
    # so we accumulate directly into it (no scratch accumulator needed).
    @pl.when(pl.program_id(1) == 0)
    def _():
        o_ref[...] = jnp.zeros_like(o_ref)

    o_ref[...] += jnp.dot(
        adj_ref[...], x_ref[...], preferred_element_type=jnp.float32
    )


def _spmm_tiled(adj, x, *, tm=256, tk=512):
    """adj @ x, row-blocked, tf = F so adj is streamed from HBM exactly once."""
    n, k = adj.shape
    _, f = x.shape
    tm = min(tm, _round_up(n, 8))
    tk = min(tk, _round_up(k, 128))
    n_p, k_p = _round_up(n, tm), _round_up(k, tk)
    if (n_p, k_p) != (n, k):
        adj = jnp.pad(adj, ((0, n_p - n), (0, k_p - k)))
        x = jnp.pad(x, ((0, k_p - k), (0, 0)))

    out = pl.pallas_call(
        _spmm_kernel,
        out_shape=jax.ShapeDtypeStruct((n_p, f), jnp.float32),
        grid_spec=pltpu.PrefetchScalarGridSpec(
            num_scalar_prefetch=0,
            grid=(n_p // tm, k_p // tk),
            in_specs=[
                pl.BlockSpec((tm, tk), lambda i, kk: (i, kk)),  # adj tile
                pl.BlockSpec((tk, f), lambda i, kk: (kk, 0)),   # x tile (full F)
            ],
            out_specs=pl.BlockSpec((tm, f), lambda i, kk: (i, 0)),
        ),
        compiler_params=pltpu.CompilerParams(
            dimension_semantics=("parallel", "arbitrary"),
            vmem_limit_bytes=48 * 1024 * 1024,
        ),
    )(adj, x)
    return out[:n] if n_p != n else out


def _combine_kernel(side_ref, bi_ref, wgc_ref, bgc_ref, wbi_ref, bbi_ref, o_ref):
    sum_emb = (
        jnp.dot(side_ref[...], wgc_ref[...], preferred_element_type=jnp.float32)
        + bgc_ref[...]
    )
    bi_emb = (
        jnp.dot(bi_ref[...], wbi_ref[...], preferred_element_type=jnp.float32)
        + bbi_ref[...]
    )
    o_ref[...] = (sum_emb + bi_emb).astype(o_ref.dtype)


def _combine_tiled(side, bi, w_gc, b_gc, w_bi, b_bi, out_dtype, *, tm=256):
    n, f_in = side.shape
    f_out = w_gc.shape[1]
    tm = min(tm, _round_up(n, 8))
    n_p = _round_up(n, tm)
    if n_p != n:
        side = jnp.pad(side, ((0, n_p - n), (0, 0)))
        bi = jnp.pad(bi, ((0, n_p - n), (0, 0)))

    out = pl.pallas_call(
        _combine_kernel,
        out_shape=jax.ShapeDtypeStruct((n_p, f_out), out_dtype),
        grid_spec=pltpu.PrefetchScalarGridSpec(
            num_scalar_prefetch=0,
            grid=(n_p // tm,),
            in_specs=[
                pl.BlockSpec((tm, f_in), lambda i: (i, 0)),      # side row block
                pl.BlockSpec((tm, f_in), lambda i: (i, 0)),      # bi row block
                pl.BlockSpec((f_in, f_out), lambda i: (0, 0)),   # W_gc (full)
                pl.BlockSpec((1, f_out), lambda i: (0, 0)),      # b_gc
                pl.BlockSpec((f_in, f_out), lambda i: (0, 0)),   # W_bi (full)
                pl.BlockSpec((1, f_out), lambda i: (0, 0)),      # b_bi
            ],
            out_specs=pl.BlockSpec((tm, f_out), lambda i: (i, 0)),
        ),
        compiler_params=pltpu.CompilerParams(
            dimension_semantics=("parallel",),
            vmem_limit_bytes=48 * 1024 * 1024,
        ),
    )(side, bi, w_gc, b_gc, w_bi, b_bi)
    return out[:n] if n_p != n else out


# ---------------------------------------------------------------------------
# Public forward
# ---------------------------------------------------------------------------
def graph_ngcf(x, adj, w_gc, b_gc, w_bi, b_bi, *, use_bf16=False, force_tiled=False):
    """Pallas forward of GraphNGCF:
       side = adj @ x ; out = side @ W_gc + b_gc + (adj @ side) @ W_bi + b_bi."""
    n, k = adj.shape
    kx, f_in = x.shape
    f_in_w, f_out = w_gc.shape
    assert k == n and kx == n, "adj must be (N, N) matching input rows"
    assert f_in_w == f_in and w_bi.shape == (f_in, f_out)
    assert b_gc.shape == (1, f_out) and b_bi.shape == (1, f_out)

    out_dtype = jnp.float32
    compute_dtype = jnp.bfloat16 if use_bf16 else jnp.float32
    adj_c = adj.astype(compute_dtype)
    x_c = x.astype(compute_dtype)
    w_gc = w_gc.astype(jnp.float32)
    b_gc = b_gc.astype(jnp.float32)
    w_bi = w_bi.astype(jnp.float32)
    b_bi = b_bi.astype(jnp.float32)

    # Rough VMEM footprint of the fully fused variant (inputs + intermediates).
    isz = jnp.dtype(compute_dtype).itemsize
    fused_bytes = (
        isz * (n * n + 2 * n * f_in)
        + 4 * (n * f_in + 2 * f_in * f_out + 2 * f_out + 2 * n * f_out)
    )
    if not force_tiled and fused_bytes <= 8 * 1024 * 1024:
        return _ngcf_fused(adj_c, x_c, w_gc, b_gc, w_bi, b_bi, out_dtype)

    # Tiled fallback for large graphs.
    side = _spmm_tiled(adj_c, x_c)                        # (N, F_in) f32
    bi = _spmm_tiled(adj_c, side.astype(compute_dtype))   # (N, F_in) f32
    return _combine_tiled(side, bi, w_gc, b_gc, w_bi, b_bi, out_dtype)


if __name__ == "__main__":
    key = jax.random.PRNGKey(0)
    k_adj, k_x, k_wgc, k_bgc, k_wbi, k_bbi = jax.random.split(key, 6)

    n_nodes, in_features, out_features = 256, 128, 64

    # Row-normalized dense adjacency (keeps magnitudes O(1), like a GCN \hat{A}).
    adj = jax.random.uniform(k_adj, (n_nodes, n_nodes), dtype=jnp.float32)
    adj = adj / jnp.sum(adj, axis=1, keepdims=True)
    x = jax.random.normal(k_x, (n_nodes, in_features), dtype=jnp.float32)

    stdv = 1.0 / (out_features ** 0.5)
    w_gc = jax.random.uniform(k_wgc, (in_features, out_features), jnp.float32, -stdv, stdv)
    b_gc = jax.random.uniform(k_bgc, (1, out_features), jnp.float32, -stdv, stdv)
    w_bi = jax.random.uniform(k_wbi, (in_features, out_features), jnp.float32, -stdv, stdv)
    b_bi = jax.random.uniform(k_bbi, (1, out_features), jnp.float32, -stdv, stdv)

    # Pure-JAX reference (== torch.mm / torch.matmul semantics).
    side_ref = adj @ x
    ref = (side_ref @ w_gc + b_gc) + ((adj @ side_ref) @ w_bi + b_bi)

    # Fused single-shot path (the regime this module is actually used in).
    out = jax.block_until_ready(graph_ngcf(x, adj, w_gc, b_gc, w_bi, b_bi))
    assert out.shape == (n_nodes, out_features)
    assert jnp.allclose(out, ref, atol=2e-3, rtol=2e-3), "fused path mismatch"

    # Tiled fallback path (what large graphs would take) — same numerics.
    out_t = jax.block_until_ready(
        graph_ngcf(x, adj, w_gc, b_gc, w_bi, b_bi, force_tiled=True)
    )
    assert jnp.allclose(out_t, ref, atol=2e-3, rtol=2e-3), "tiled path mismatch"

    print("KERNEL_OK")
</pallas_src>

<mosaic_0001>
module attributes {stable_mosaic.version = 11 : i64} {
  func.func @_ngcf_fused_kernel(%arg0: memref<256x256xf32, #tpu.memory_space<vmem>>, %arg1: memref<256x128xf32, #tpu.memory_space<vmem>>, %arg2: memref<128x64xf32, #tpu.memory_space<vmem>>, %arg3: memref<1x64xf32, #tpu.memory_space<vmem>>, %arg4: memref<128x64xf32, #tpu.memory_space<vmem>>, %arg5: memref<1x64xf32, #tpu.memory_space<vmem>>, %arg6: memref<256x64xf32, #tpu.memory_space<vmem>>) attributes {dimension_semantics = [], scalar_prefetch = 0 : i64, scratch_operands = 0 : i64, tpu.core_type = #tpu.core_type<tc>} {
    %c0 = arith.constant 0 : index
    %c0_0 = arith.constant 0 : index
    %0 = vector.load %arg0[%c0, %c0_0] : memref<256x256xf32, #tpu.memory_space<vmem>>, vector<256x256xf32>
    %c0_1 = arith.constant 0 : index
    %c0_2 = arith.constant 0 : index
    %1 = vector.load %arg1[%c0_1, %c0_2] : memref<256x128xf32, #tpu.memory_space<vmem>>, vector<256x128xf32>
    %cst = arith.constant dense<0.000000e+00> : vector<256x128xf32>
    %2 = tpu.matmul %0, %1, %cst {dimension_numbers = #tpu.dot_dimension_numbers<[1], [0], [0], [1], [0, 0, 1, 1], [], []>} : vector<256x256xf32>, vector<256x128xf32>, vector<256x128xf32> -> vector<256x128xf32>
    %cst_3 = arith.constant dense<0.000000e+00> : vector<256x128xf32>
    %3 = tpu.matmul %0, %2, %cst_3 {dimension_numbers = #tpu.dot_dimension_numbers<[1], [0], [0], [1], [0, 0, 1, 1], [], []>} : vector<256x256xf32>, vector<256x128xf32>, vector<256x128xf32> -> vector<256x128xf32>
    %c0_4 = arith.constant 0 : index
    %c0_5 = arith.constant 0 : index
    %4 = vector.load %arg2[%c0_4, %c0_5] : memref<128x64xf32, #tpu.memory_space<vmem>>, vector<128x64xf32>
    %cst_6 = arith.constant dense<0.000000e+00> : vector<256x64xf32>
    %5 = tpu.matmul %2, %4, %cst_6 {dimension_numbers = #tpu.dot_dimension_numbers<[1], [0], [0], [1], [0, 0, 1, 1], [], []>} : vector<256x128xf32>, vector<128x64xf32>, vector<256x64xf32> -> vector<256x64xf32>
    %c0_7 = arith.constant 0 : index
    %c0_8 = arith.constant 0 : index
    %6 = vector.load %arg3[%c0_7, %c0_8] : memref<1x64xf32, #tpu.memory_space<vmem>>, vector<1x64xf32>
    %7 = vector.broadcast %6 : vector<1x64xf32> to vector<256x64xf32>
    %8 = arith.addf %5, %7 : vector<256x64xf32>
    %c0_9 = arith.constant 0 : index
    %c0_10 = arith.constant 0 : index
    %9 = vector.load %arg4[%c0_9, %c0_10] : memref<128x64xf32, #tpu.memory_space<vmem>>, vector<128x64xf32>
    %cst_11 = arith.constant dense<0.000000e+00> : vector<256x64xf32>
    %10 = tpu.matmul %3, %9, %cst_11 {dimension_numbers = #tpu.dot_dimension_numbers<[1], [0], [0], [1], [0, 0, 1, 1], [], []>} : vector<256x128xf32>, vector<128x64xf32>, vector<256x64xf32> -> vector<256x64xf32>
    %c0_12 = arith.constant 0 : index
    %c0_13 = arith.constant 0 : index
    %11 = vector.load %arg5[%c0_12, %c0_13] : memref<1x64xf32, #tpu.memory_space<vmem>>, vector<1x64xf32>
    %12 = vector.broadcast %11 : vector<1x64xf32> to vector<256x64xf32>
    %13 = arith.addf %10, %12 : vector<256x64xf32>
    %14 = arith.addf %8, %13 : vector<256x64xf32>
    %c0_14 = arith.constant 0 : index
    %c0_15 = arith.constant 0 : index
    %15 = vector.load %arg6[%c0_14, %c0_15] : memref<256x64xf32, #tpu.memory_space<vmem>>, vector<256x64xf32>
    tpu.vector_store %arg6[%c0_14, %c0_15], %14 {strides = array<i32>} : memref<256x64xf32, #tpu.memory_space<vmem>>, vector<256x64xf32>,
    return
  }
}

</mosaic_0001>

<bundles_post_ra>
// kernel: tpu_custom_call.1
= control target key start
LH: loop header
LB: loop body
LE: loop exit
PB: predicated region body
PF: predicated region fallthrough
CT: control target
= control target key end

     0   :  { %11 = vsyncpa [#allocation3], 0  ;;  %s986_s24 = smov [#allocation2]   ;;  %s987_s26 = smov 256   ;;  %s1807_s0 = inlined_call_operand.hbm [shape: f32[256,256], index: 0, kind: input, shape index: {}]   ;;  %s1808_s1 = inlined_call_operand.vmem [shape: f32[256,128], index: 1, kind: input, shape index: {}]   ;;  %s1809_s2 = inlined_call_operand.vmem [shape: f32[128,64], index: 2, kind: input, shape index: {}]   ;;  %s1810_s3 = inlined_call_operand.vmem [shape: f32[1,64], index: 3, kind: input, shape index: {}]   ;;  %s1811_s4 = inlined_call_operand.vmem [shape: f32[128,64], index: 4, kind: input, shape index: {}]   ;;  %s1812_s5 = inlined_call_operand.vmem [shape: f32[1,64], index: 5, kind: input, shape index: {}]   ;;  %s1813_s6 = inlined_call_operand.vmem [shape: f32[256,64], index: 6, kind: output, shape index: {}]  }
   0x1   :  { %s16_s23 = sshll.u32 %s1807_s0, 4  ;;  %s18_s25 = sshll.u32 %s986_s24, 4  ;;  %s17_s23 = int_to_ptr.hbm [resolvable:$true] %s16_s23  ;;  %s19_s25 = int_to_ptr.vmem [resolvable:$true] %s18_s25 }
   0x2   :  { %s988_s27 = smov 16  }
   0x3   :  { %24 = dma.hbm_to_vmem [thread:$0]  %s17_s23, 8192, %s19_s25, [#allocation3], %s987_s26, %s987_s26, %s988_s27  }
   0x4   :  { %984 = dma.done.wait [#allocation3], 8192  }
   0x5   :  { %985 = vsyncadd [#allocation3], 4294959104  ;;  %v118_v0 = vld [vmem:[%s1808_s1 + $0x78] sm:$0xff]  ;;  %v117_v2 = vld [vmem:[%s1808_s1 + $0x70] sm:$0xff]  ;;  %vm885_vm0 = vcmask 523264  }
   0x6   :  { %v134_v1 = vld [vmem:[%s1808_s1 + $0xf8] sm:$0xff]  ;;  %135 = vmatpush.msra.mxu0 %v118_v0  ;;  %923 = vmatpush.msra.mxu2 %v118_v0  ;;  %v133_v3 = vld [vmem:[%s1808_s1 + $0xf0] sm:$0xff]  ;;  %v116_v4 = vld [vmem:[%s1808_s1 + $0x68] sm:$0xff] }
   0x7   :  { %248 = vmatpush.msra.mxu1 %v134_v1  ;;  %939 = vmatpush.msra.mxu3 %v134_v1  ;;  %v132_v5 = vld [vmem:[%s1808_s1 + $0xe8] sm:$0xff]  ;;  %v115_v6 = vld [vmem:[%s1808_s1 + $0x60] sm:$0xff]  ;;  %v114_v8 = vld [vmem:[%s1808_s1 + $0x58] sm:$0xff] }
   0x8   :  { %136 = vmatpush.msra.mxu0 %v117_v2  ;;  %924 = vmatpush.msra.mxu2 %v117_v2  ;;  %v131_v7 = vld [vmem:[%s1808_s1 + $0xe0] sm:$0xff]  ;;  %v130_v9 = vld [vmem:[%s1808_s1 + $0xd8] sm:$0xff]  ;;  %v113_v10 = vld [vmem:[%s1808_s1 + $0x50] sm:$0xff] }
   0x9   :  { %249 = vmatpush.msra.mxu1 %v133_v3  ;;  %940 = vmatpush.msra.mxu3 %v133_v3  ;;  %v129_v11 = vld [vmem:[%s1808_s1 + $0xd0] sm:$0xff]  ;;  %v112_v12 = vld [vmem:[%s1808_s1 + $0x48] sm:$0xff]  ;;  %v111_v14 = vld [vmem:[%s1808_s1 + $0x40] sm:$0xff] }
   0xa   :  { %137 = vmatpush.msra.mxu0 %v116_v4  ;;  %925 = vmatpush.msra.mxu2 %v116_v4  ;;  %v128_v13 = vld [vmem:[%s1808_s1 + $0xc8] sm:$0xff]  ;;  %v127_v15 = vld [vmem:[%s1808_s1 + $0xc0] sm:$0xff]  ;;  %v110_v16 = vld [vmem:[%s1808_s1 + $0x38] sm:$0xff] }
   0xb   :  { %250 = vmatpush.msra.mxu1 %v132_v5  ;;  %941 = vmatpush.msra.mxu3 %v132_v5  ;;  %v126_v17 = vld [vmem:[%s1808_s1 + $0xb8] sm:$0xff]  ;;  %v109_v18 = vld [vmem:[%s1808_s1 + $0x30] sm:$0xff]  ;;  %v108_v20 = vld [vmem:[%s1808_s1 + $0x28] sm:$0xff] }
   0xc   :  { %138 = vmatpush.msra.mxu0 %v115_v6  ;;  %926 = vmatpush.msra.mxu2 %v115_v6  ;;  %v125_v19 = vld [vmem:[%s1808_s1 + $0xb0] sm:$0xff]  ;;  %v124_v21 = vld [vmem:[%s1808_s1 + $0xa8] sm:$0xff]  ;;  %v107_v22 = vld [vmem:[%s1808_s1 + $0x20] sm:$0xff] }
   0xd   :  { %251 = vmatpush.msra.mxu1 %v131_v7  ;;  %942 = vmatpush.msra.mxu3 %v131_v7  ;;  %v123_v23 = vld [vmem:[%s1808_s1 + $0xa0] sm:$0xff]  ;;  %v106_v24 = vld [vmem:[%s1808_s1 + $0x18] sm:$0xff]  ;;  %v105_v26 = vld [vmem:[%s1808_s1 + $0x10] sm:$0xff] }
   0xe   :  { %139 = vmatpush.msra.mxu0 %v114_v8  ;;  %927 = vmatpush.msra.mxu2 %v114_v8  ;;  %v122_v25 = vld [vmem:[%s1808_s1 + $0x98] sm:$0xff]  ;;  %v121_v27 = vld [vmem:[%s1808_s1 + $0x90] sm:$0xff]  ;;  %v104_v28 = vld [vmem:[%s1808_s1 + $0x8] sm:$0xff] }
   0xf   :  { %252 = vmatpush.msra.mxu1 %v130_v9  ;;  %943 = vmatpush.msra.mxu3 %v130_v9  ;;  %v120_v29 = vld [vmem:[%s1808_s1 + $0x88] sm:$0xff]  ;;  %v103_v30 = vld [vmem:[%s1808_s1] sm:$0xff]  ;;  %v1135_v36 = vld [vmem:[#allocation2 + $0x10] sm:$0xff] }
  0x10   :  { %140 = vmatpush.msra.mxu0 %v113_v10  ;;  %928 = vmatpush.msra.mxu2 %v113_v10  ;;  %v119_v31 = vld [vmem:[%s1808_s1 + $0x80] sm:$0xff]  ;;  %v1127_v34 = vld [vmem:[#allocation2 + $0x8] sm:$0xff]  ;;  %v1137_v37 = vld [vmem:[#allocation2 + $0x110] sm:$0xff] }
  0x11   :  { %253 = vmatpush.msra.mxu1 %v129_v11  ;;  %944 = vmatpush.msra.mxu3 %v129_v11  ;;  %v1123_v32 = vld [vmem:[#allocation2] sm:$0xff]  ;;  %v1129_v35 = vld [vmem:[#allocation2 + $0x108] sm:$0xff]  ;;  %1871 = vst [vmem:[#allocation7_spill] sm:$0xff] %v1137_v37  ;;  %v1139_v38 = vld [vmem:[#allocation2 + $0x18] sm:$0xff] }
  0x12   :  { %141 = vmatpush.msra.mxu0 %v112_v12  ;;  %929 = vmatpush.msra.mxu2 %v112_v12  ;;  %v1125_v33 = vld [vmem:[#allocation2 + $0x100] sm:$0xff]  ;;  %1870 = vst [vmem:[#allocation6_spill] sm:$0xff] %v1129_v35  ;;  %v1141_v39 = vld [vmem:[#allocation2 + $0x118] sm:$0xff]  ;;  %v1151_v42 = vld [vmem:[#allocation2 + $0x28] sm:$0xff] }
  0x13   :  { %254 = vmatpush.msra.mxu1 %v128_v13  ;;  %945 = vmatpush.msra.mxu3 %v128_v13  ;;  %1869 = vst [vmem:[#allocation5_spill] sm:$0xff] %v1125_v33  ;;  %v1147_v40 = vld [vmem:[#allocation2 + $0x20] sm:$0xff]  ;;  %v1153_v43 = vld [vmem:[#allocation2 + $0x128] sm:$0xff]  ;;  %v1159_v44 = vld [vmem:[#allocation2 + $0x30] sm:$0xff] }
  0x14   :  { %142 = vmatpush.msra.mxu0 %v111_v14  ;;  %930 = vmatpush.msra.mxu2 %v111_v14  ;;  %1872 = vst [vmem:[#allocation8_spill] sm:$0xff] %v1141_v39  ;;  %v1149_v41 = vld [vmem:[#allocation2 + $0x120] sm:$0xff]  ;;  %v1161_v45 = vld [vmem:[#allocation2 + $0x130] sm:$0xff]  ;;  %v1163_v46 = vld [vmem:[#allocation2 + $0x38] sm:$0xff] }
  0x15   :  { %255 = vmatpush.msra.mxu1 %v127_v15  ;;  %946 = vmatpush.msra.mxu3 %v127_v15  ;;  %1873 = vst [vmem:[#allocation9_spill] sm:$0xff] %v1149_v41  ;;  %v1165_v47 = vld [vmem:[#allocation2 + $0x138] sm:$0xff]  ;;  %v1171_v48 = vld [vmem:[#allocation2 + $0x40] sm:$0xff]  ;;  %v1175_v50 = vld [vmem:[#allocation2 + $0x48] sm:$0xff] }
  0x16   :  { %143 = vmatpush.msra.mxu0 %v110_v16  ;;  %931 = vmatpush.msra.mxu2 %v110_v16  ;;  %1874 = vst [vmem:[#allocation10_spill] sm:$0xff] %v1153_v43  ;;  %v1173_v49 = vld [vmem:[#allocation2 + $0x140] sm:$0xff]  ;;  %v1177_v51 = vld [vmem:[#allocation2 + $0x148] sm:$0xff]  ;;  %v1183_v52 = vld [vmem:[#allocation2 + $0x50] sm:$0xff] }
  0x17   :  { %256 = vmatpush.msra.mxu1 %v126_v17  ;;  %947 = vmatpush.msra.mxu3 %v126_v17  ;;  %1875 = vst [vmem:[#allocation11_spill] sm:$0xff] %v1161_v45  ;;  %v1185_v53 = vld [vmem:[#allocation2 + $0x150] sm:$0xff]  ;;  %v1187_v54 = vld [vmem:[#allocation2 + $0x58] sm:$0xff]  ;;  %v1195_v56 = vld [vmem:[#allocation2 + $0x60] sm:$0xff] }
  0x18   :  { %144 = vmatpush.msra.mxu0 %v109_v18  ;;  %932 = vmatpush.msra.mxu2 %v109_v18  ;;  %1876 = vst [vmem:[#allocation12_spill] sm:$0xff] %v1165_v47  ;;  %v1189_v55 = vld [vmem:[#allocation2 + $0x158] sm:$0xff]  ;;  %v1197_v57 = vld [vmem:[#allocation2 + $0x160] sm:$0xff]  ;;  %v1199_v58 = vld [vmem:[#allocation2 + $0x68] sm:$0xff] }
  0x19   :  { %257 = vmatpush.msra.mxu1 %v125_v19  ;;  %948 = vmatpush.msra.mxu3 %v125_v19  ;;  %1877 = vst [vmem:[#allocation13_spill] sm:$0xff] %v1173_v49  ;;  %v1201_v59 = vld [vmem:[#allocation2 + $0x168] sm:$0xff]  ;;  %v1207_v60 = vld [vmem:[#allocation2 + $0x70] sm:$0xff]  ;;  %v1211_v62 = vld [vmem:[#allocation2 + $0x78] sm:$0xff] }
  0x1a   :  { %145 = vmatpush.msra.mxu0 %v108_v20  ;;  %933 = vmatpush.msra.mxu2 %v108_v20  ;;  %1878 = vst [vmem:[#allocation14_spill] sm:$0xff] %v1175_v50  ;;  %v1209_v61 = vld [vmem:[#allocation2 + $0x170] sm:$0xff]  ;;  %v1213_v63 = vld [vmem:[#allocation2 + $0x178] sm:$0xff]  ;;  %v1219_v0 = vld [vmem:[#allocation2 + $0x80] sm:$0xff] }
  0x1b   :  { %258 = vmatpush.msra.mxu1 %v124_v21  ;;  %949 = vmatpush.msra.mxu3 %v124_v21  ;;  %1879 = vst [vmem:[#allocation15_spill] sm:$0xff] %v1177_v51  ;;  %v1221_v1 = vld [vmem:[#allocation2 + $0x180] sm:$0xff]  ;;  %v1223_v2 = vld [vmem:[#allocation2 + $0x88] sm:$0xff]  ;;  %v602_v4 = vld [vmem:[%s1809_s2 + $0x78] sm:$0xff] }
  0x1c   :  { %146 = vmatpush.msra.mxu0 %v107_v22  ;;  %934 = vmatpush.msra.mxu2 %v107_v22  ;;  %1880 = vst [vmem:[#allocation16_spill] sm:$0xff] %v1183_v52  ;;  %v1225_v3 = vld [vmem:[#allocation2 + $0x188] sm:$0xff]  ;;  %v601_v5 = vld [vmem:[%s1809_s2 + $0x70] sm:$0xff]  ;;  %v1244_v9 = vld [vmem:[#allocation2 + $0x98] sm:$0xff] }
  0x1d   :  { %259 = vmatpush.msra.mxu1 %v123_v23  ;;  %950 = vmatpush.msra.mxu3 %v123_v23  ;;  %1881 = vst [vmem:[#allocation17_spill] sm:$0xff] %v1185_v53  ;;  %v600_v6 = vld [vmem:[%s1809_s2 + $0x68] sm:$0xff]  ;;  %v1240_v7 = vld [vmem:[#allocation2 + $0x90] sm:$0xff]  ;;  %v1246_v10 = vld [vmem:[#allocation2 + $0x198] sm:$0xff] }
  0x1e   :  { %147 = vmatpush.msra.mxu0 %v106_v24  ;;  %935 = vmatpush.msra.mxu2 %v106_v24  ;;  %1882 = vst [vmem:[#allocation18_spill] sm:$0xff] %v1187_v54  ;;  %v1242_v8 = vld [vmem:[#allocation2 + $0x190] sm:$0xff]  ;;  %v599_v11 = vld [vmem:[%s1809_s2 + $0x60] sm:$0xff]  ;;  %v598_v12 = vld [vmem:[%s1809_s2 + $0x58] sm:$0xff] }
  0x1f   :  { %260 = vmatpush.msra.mxu1 %v122_v25  ;;  %951 = vmatpush.msra.mxu3 %v122_v25  ;;  %1883 = vst [vmem:[#allocation19_spill] sm:$0xff] %v1189_v55  ;;  %v597_v13 = vld [vmem:[%s1809_s2 + $0x50] sm:$0xff]  ;;  %v1261_v14 = vld [vmem:[#allocation2 + $0xa0] sm:$0xff]  ;;  %v1265_v16 = vld [vmem:[#allocation2 + $0xa8] sm:$0xff] }
  0x20   :  { %148 = vmatpush.msra.mxu0 %v105_v26  ;;  %936 = vmatpush.msra.mxu2 %v105_v26  ;;  %1884 = vst [vmem:[#allocation20_spill] sm:$0xff] %v1195_v56  ;;  %v1263_v15 = vld [vmem:[#allocation2 + $0x1a0] sm:$0xff]  ;;  %v1267_v17 = vld [vmem:[#allocation2 + $0x1a8] sm:$0xff]  ;;  %v594_v20 = vld [vmem:[%s1809_s2 + $0x38] sm:$0xff] }
  0x21   :  { %261 = vmatpush.msra.mxu1 %v121_v27  ;;  %952 = vmatpush.msra.mxu3 %v121_v27  ;;  %1885 = vst [vmem:[#allocation21_spill] sm:$0xff] %v1197_v57  ;;  %v596_v18 = vld [vmem:[%s1809_s2 + $0x48] sm:$0xff]  ;;  %v595_v19 = vld [vmem:[%s1809_s2 + $0x40] sm:$0xff]  ;;  %v1282_v21 = vld [vmem:[#allocation2 + $0xb0] sm:$0xff] }
  0x22   :  { %149 = vmatpush.msra.mxu0 %v104_v28  ;;  %937 = vmatpush.msra.mxu2 %v104_v28  ;;  %1886 = vst [vmem:[#allocation22_spill] sm:$0xff] %v1199_v58  ;;  %v1284_v22 = vld [vmem:[#allocation2 + $0x1b0] sm:$0xff]  ;;  %v1286_v23 = vld [vmem:[#allocation2 + $0xb8] sm:$0xff]  ;;  %v592_v26 = vld [vmem:[%s1809_s2 + $0x28] sm:$0xff] }
  0x23   :  { %262 = vmatpush.msra.mxu1 %v120_v29  ;;  %953 = vmatpush.msra.mxu3 %v120_v29  ;;  %1887 = vst [vmem:[#allocation23_spill] sm:$0xff] %v1201_v59  ;;  %v1288_v24 = vld [vmem:[#allocation2 + $0x1b8] sm:$0xff]  ;;  %v593_v25 = vld [vmem:[%s1809_s2 + $0x30] sm:$0xff]  ;;  %v591_v27 = vld [vmem:[%s1809_s2 + $0x20] sm:$0xff] }
  0x24   :  { %150 = vmatpush.msra.mxu0 %v103_v30  ;;  %938 = vmatpush.msra.mxu2 %v103_v30  ;;  %1888 = vst [vmem:[#allocation24_spill] sm:$0xff] %v1207_v60  ;;  %v1303_v28 = vld [vmem:[#allocation2 + $0xc0] sm:$0xff]  ;;  %v1307_v30 = vld [vmem:[#allocation2 + $0xc8] sm:$0xff] }
  0x25   :  { %263 = vmatpush.msra.mxu1 %v119_v31  ;;  %954 = vmatpush.msra.mxu3 %v119_v31  ;;  %1889 = vst [vmem:[#allocation25_spill] sm:$0xff] %v1209_v61  ;;  %v1305_v29 = vld [vmem:[#allocation2 + $0x1c0] sm:$0xff]  ;;  %v1309_v31 = vld [vmem:[#allocation2 + $0x1c8] sm:$0xff] }
  0x26   :  { %151 = vmatmul.f32.vlgmr.msra.gmra.mxu0 %v1123_v32  ;;  %199 = vmatmul.f32.vlgmr.msra.gmra.mxu2 %v1125_v33  ;;  %1890 = vst [vmem:[#allocation26_spill] sm:$0xff] %v1211_v62 }
  0x27   :  { %264 = vmatmul.f32.vlgmr.msra.gmra.mxu1 %v1127_v34  ;;  %312 = vmatmul.f32.vlgmr.msra.gmra.mxu3 %v1129_v35  ;;  %1891 = vst [vmem:[#allocation27_spill] sm:$0xff] %v1213_v63 }
  0x28   :  { %1892 = vst [vmem:[#allocation28_spill] sm:$0xff] %v1219_v0  ;;  %607 = vmatpush.msrb.mxu0 %v602_v4  ;;  %v590_v4 = vld [vmem:[%s1809_s2 + $0x18] sm:$0xff] }
  0x29   :  { %1893 = vst [vmem:[#allocation29_spill] sm:$0xff] %v1221_v1 }
  0x2a   :  { %1894 = vst [vmem:[#allocation30_spill] sm:$0xff] %v1223_v2  ;;  %608 = vmatpush.msrb.mxu0 %v601_v5  ;;  %v589_v5 = vld [vmem:[%s1809_s2 + $0x10] sm:$0xff] }
  0x2b   :  { %1895 = vst [vmem:[#allocation31_spill] sm:$0xff] %v1225_v3 }
  0x2c   :  { %1896 = vst [vmem:[#allocation32_spill] sm:$0xff] %v1240_v7  ;;  %609 = vmatpush.msrb.mxu0 %v600_v6  ;;  %v588_v6 = vld [vmem:[%s1809_s2 + $0x8] sm:$0xff] }
  0x2d   :  { %1897 = vst [vmem:[#allocation33_spill] sm:$0xff] %v1242_v8 }
  0x2e   :  { %154 = vmatmul.f32.gmra.mxu0 %v1135_v36  ;;  %202 = vmatmul.f32.gmra.mxu2 %v1137_v37  ;;  %1898 = vst [vmem:[#allocation34_spill] sm:$0xff] %v1244_v9 }
  0x2f   :  { %267 = vmatmul.f32.gmra.mxu1 %v1139_v38  ;;  %315 = vmatmul.f32.gmra.mxu3 %v1141_v39  ;;  %1899 = vst [vmem:[#allocation35_spill] sm:$0xff] %v1246_v10 }
  0x30   :  { %610 = vmatpush.msrb.mxu0 %v599_v11  ;;  %1900 = vst [vmem:[#allocation36_spill] sm:$0xff] %v1261_v14  ;;  %v1324_v11 = vld [vmem:[#allocation2 + $0xd0] sm:$0xff] }
  0x31   :  { %1901 = vst [vmem:[#allocation37_spill] sm:$0xff] %v1263_v15 }
  0x32   :  { %611 = vmatpush.msrb.mxu0 %v598_v12  ;;  %1902 = vst [vmem:[#allocation38_spill] sm:$0xff] %v1265_v16  ;;  %v1326_v12 = vld [vmem:[#allocation2 + $0x1d0] sm:$0xff] }
  0x33   :  { %1903 = vst [vmem:[#allocation39_spill] sm:$0xff] %v1267_v17 }
  0x34   :  { %612 = vmatpush.msrb.mxu0 %v597_v13  ;;  %1904 = vst [vmem:[#allocation40_spill] sm:$0xff] %v1282_v21  ;;  %v1328_v13 = vld [vmem:[#allocation2 + $0xd8] sm:$0xff] }
  0x35   :  { %1905 = vst [vmem:[#allocation41_spill] sm:$0xff] %v1284_v22 }
  0x36   :  { %157 = vmatmul.f32.gmra.mxu0 %v1147_v40  ;;  %205 = vmatmul.f32.gmra.mxu2 %v1149_v41  ;;  %1906 = vst [vmem:[#allocation42_spill] sm:$0xff] %v1286_v23 }
  0x37   :  { %270 = vmatmul.f32.gmra.mxu1 %v1151_v42  ;;  %318 = vmatmul.f32.gmra.mxu3 %v1153_v43  ;;  %1907 = vst [vmem:[#allocation43_spill] sm:$0xff] %v1288_v24 }
  0x38   :  { %613 = vmatpush.msrb.mxu0 %v596_v18  ;;  %1908 = vst [vmem:[#allocation44_spill] sm:$0xff] %v1303_v28  ;;  %v1330_v18 = vld [vmem:[#allocation2 + $0x1d8] sm:$0xff] }
  0x39   :  { %1909 = vst [vmem:[#allocation45_spill] sm:$0xff] %v1305_v29 }
  0x3a   :  { %614 = vmatpush.msrb.mxu0 %v595_v19  ;;  %1910 = vst [vmem:[#allocation46_spill] sm:$0xff] %v1307_v30  ;;  %v587_v19 = vld [vmem:[%s1809_s2] sm:$0xff] }
  0x3b   :  { %1911 = vst [vmem:[#allocation47_spill] sm:$0xff] %v1309_v31 }
  0x3c   :  { %615 = vmatpush.msrb.mxu0 %v594_v20  ;;  %1912 = vst [vmem:[#allocation48_spill] sm:$0xff] %v1324_v11  ;;  %v1339_v20 = vld [vmem:[#allocation2 + $0xe0] sm:$0xff] }
  0x3d   :  { %1913 = vst [vmem:[#allocation49_spill] sm:$0xff] %v1326_v12 }
  0x3e   :  { %160 = vmatmul.f32.gmra.mxu0 %v1159_v44  ;;  %208 = vmatmul.f32.gmra.mxu2 %v1161_v45  ;;  %1914 = vst [vmem:[#allocation50_spill] sm:$0xff] %v1328_v13 }
  0x3f   :  { %273 = vmatmul.f32.gmra.mxu1 %v1163_v46  ;;  %321 = vmatmul.f32.gmra.mxu3 %v1165_v47  ;;  %1915 = vst [vmem:[#allocation51_spill] sm:$0xff] %v1330_v18 }
  0x40   :  { %616 = vmatpush.msrb.mxu0 %v593_v25  ;;  %1916 = vst [vmem:[#allocation52_spill] sm:$0xff] %v1339_v20  ;;  %v1341_v25 = vld [vmem:[#allocation2 + $0x1e0] sm:$0xff] }
  0x41   :  { %1917 = vst [vmem:[#allocation53_spill] sm:$0xff] %v1341_v25 }
  0x42   :  { %617 = vmatpush.msrb.mxu0 %v592_v26  ;;  %v1343_v26 = vld [vmem:[#allocation2 + $0xe8] sm:$0xff] }
  0x43   :  { %1918 = vst [vmem:[#allocation54_spill] sm:$0xff] %v1343_v26 }
  0x44   :  { %618 = vmatpush.msrb.mxu0 %v591_v27  ;;  %v1345_v27 = vld [vmem:[#allocation2 + $0x1e8] sm:$0xff] }
  0x45   :  { %1919 = vst [vmem:[#allocation55_spill] sm:$0xff] %v1345_v27 }
  0x46   :  { %163 = vmatmul.f32.gmra.mxu0 %v1171_v48  ;;  %211 = vmatmul.f32.gmra.mxu2 %v1173_v49 }
  0x47   :  { %276 = vmatmul.f32.gmra.mxu1 %v1175_v50  ;;  %324 = vmatmul.f32.gmra.mxu3 %v1177_v51 }
  0x48   :  { %619 = vmatpush.msrb.mxu0 %v590_v4  ;;  %v1351_v4 = vld [vmem:[#allocation2 + $0xf0] sm:$0xff] }
  0x49   :  { %1920 = vst [vmem:[#allocation56_spill] sm:$0xff] %v1351_v4 }
  0x4a   :  { %620 = vmatpush.msrb.mxu0 %v589_v5  ;;  %v1353_v5 = vld [vmem:[#allocation2 + $0x1f0] sm:$0xff] }
  0x4b   :  { %1921 = vst [vmem:[#allocation57_spill] sm:$0xff] %v1353_v5 }
  0x4c   :  { %621 = vmatpush.msrb.mxu0 %v588_v6  ;;  %v1355_v6 = vld [vmem:[#allocation2 + $0xf8] sm:$0xff] }
  0x4d   :  { %1922 = vst [vmem:[#allocation58_spill] sm:$0xff] %v1355_v6 }
  0x4e   :  { %166 = vmatmul.f32.gmra.mxu0 %v1183_v52  ;;  %214 = vmatmul.f32.gmra.mxu2 %v1185_v53 }
  0x4f   :  { %279 = vmatmul.f32.gmra.mxu1 %v1187_v54  ;;  %327 = vmatmul.f32.gmra.mxu3 %v1189_v55 }
  0x50   :  { %622 = vmatpush.msrb.mxu0 %v587_v19  ;;  %v1357_v19 = vld [vmem:[#allocation2 + $0x1f8] sm:$0xff] }
  0x51   :  { %1923 = vst [vmem:[#allocation59_spill] sm:$0xff] %v1357_v19 }
  0x56   :  { %169 = vmatmul.f32.gmra.mxu0 %v1195_v56  ;;  %217 = vmatmul.f32.gmra.mxu2 %v1197_v57 }
  0x57   :  { %282 = vmatmul.f32.gmra.mxu1 %v1199_v58  ;;  %330 = vmatmul.f32.gmra.mxu3 %v1201_v59 }
  0x5e   :  { %172 = vmatmul.f32.gmra.mxu0 %v1207_v60  ;;  %220 = vmatmul.f32.gmra.mxu2 %v1209_v61 }
  0x5f   :  { %285 = vmatmul.f32.gmra.mxu1 %v1211_v62  ;;  %333 = vmatmul.f32.gmra.mxu3 %v1213_v63 }
  0x66   :  { %175 = vmatmul.f32.gmra.mxu0 %v1219_v0  ;;  %223 = vmatmul.f32.gmra.mxu2 %v1221_v1 }
  0x67   :  { %288 = vmatmul.f32.gmra.mxu1 %v1223_v2  ;;  %336 = vmatmul.f32.gmra.mxu3 %v1225_v3 }
  0x6e   :  { %178 = vmatmul.f32.gmra.mxu0 %v1240_v7  ;;  %226 = vmatmul.f32.gmra.mxu2 %v1242_v8 }
  0x6f   :  { %291 = vmatmul.f32.gmra.mxu1 %v1244_v9  ;;  %339 = vmatmul.f32.gmra.mxu3 %v1246_v10 }
  0x76   :  { %181 = vmatmul.f32.gmra.mxu0 %v1261_v14  ;;  %229 = vmatmul.f32.gmra.mxu2 %v1263_v15 }
  0x77   :  { %294 = vmatmul.f32.gmra.mxu1 %v1265_v16  ;;  %342 = vmatmul.f32.gmra.mxu3 %v1267_v17 }
  0x7e   :  { %184 = vmatmul.f32.gmra.mxu0 %v1282_v21  ;;  %232 = vmatmul.f32.gmra.mxu2 %v1284_v22 }
  0x7f   :  { %297 = vmatmul.f32.gmra.mxu1 %v1286_v23  ;;  %345 = vmatmul.f32.gmra.mxu3 %v1288_v24 }
  0x86   :  { %187 = vmatmul.f32.gmra.mxu0 %v1303_v28  ;;  %235 = vmatmul.f32.gmra.mxu2 %v1305_v29 }
  0x87   :  { %300 = vmatmul.f32.gmra.mxu1 %v1307_v30  ;;  %348 = vmatmul.f32.gmra.mxu3 %v1309_v31 }
  0x8e   :  { %190 = vmatmul.f32.gmra.mxu0 %v1324_v11  ;;  %238 = vmatmul.f32.gmra.mxu2 %v1326_v12 }
  0x8f   :  { %303 = vmatmul.f32.gmra.mxu1 %v1328_v13  ;;  %351 = vmatmul.f32.gmra.mxu3 %v1330_v18 }
  0x96   :  { %193 = vmatmul.f32.gmra.mxu0 %v1339_v20  ;;  %241 = vmatmul.f32.gmra.mxu2 %v1341_v25 }
  0x97   :  { %306 = vmatmul.f32.gmra.mxu1 %v1343_v26  ;;  %354 = vmatmul.f32.gmra.mxu3 %v1345_v27 }
  0x9e   :  { %196 = vmatmul.f32.gmra.mxu0 %v1351_v4  ;;  %244 = vmatmul.f32.gmra.mxu2 %v1353_v5 }
  0x9f   :  { %309 = vmatmul.f32.gmra.mxu1 %v1355_v6  ;;  %357 = vmatmul.f32.gmra.mxu3 %v1357_v19 }
  0xa3   :  { %v152_v25 = vpop.f32.mrf.mxu0 }
  0xa4   :  { %v265_v18 = vpop.f32.mrf.mxu1 }
  0xa5   :  { %v1363_v12 = vadd.f32 %v265_v18, %v152_v25 }
  0xa7   :  { %623 = vmatmul.f32.vlgmr.msrb.gmra.mxu0 %v1363_v12 }
  0xa9   :  { %v1366_v27 = vpop.f32.mrf.mxu2 }
  0xaa   :  { %v1368_v31 = vpop.f32.mrf.mxu3 }
  0xab   :  { %v155_v29 = vpop.f32.mrf.mxu0 }
  0xac   :  { %v268_v24 = vpop.f32.mrf.mxu1 }
  0xad   :  { %v1370_v22 = vadd.f32 %v268_v24, %v155_v29 }
  0xaf   :  { %626 = vmatmul.f32.gmra.mxu0 %v1370_v22 }
  0xb1   :  { %v1373_v5 = vpop.f32.mrf.mxu2 }
  0xb2   :  { %v1375_v17 = vpop.f32.mrf.mxu3 }
  0xb3   :  { %v158_v19 = vpop.f32.mrf.mxu0 }
  0xb4   :  { %v271_v15 = vpop.f32.mrf.mxu1 }
  0xb5   :  { %v1377_v18 = vadd.f32 %v271_v15, %v158_v19 }
  0xb7   :  { %629 = vmatmul.f32.gmra.mxu0 %v1377_v18 }
  0xb9   :  { %v1380_v25 = vpop.f32.mrf.mxu2 }
  0xba   :  { %v1382_v10 = vpop.f32.mrf.mxu3 }
  0xbb   :  { %v161_v8 = vpop.f32.mrf.mxu0 }
  0xbc   :  { %v274_v3 = vpop.f32.mrf.mxu1 }
  0xbd   :  { %v1384_v24 = vadd.f32 %v274_v3, %v161_v8 }
  0xbf   :  { %632 = vmatmul.f32.gmra.mxu0 %v1384_v24 }
  0xc1   :  { %v1387_v29 = vpop.f32.mrf.mxu2 }
  0xc2   :  { %v1389_v1 = vpop.f32.mrf.mxu3 }
  0xc3   :  { %v164_v63 = vpop.f32.mrf.mxu0 }
  0xc4   :  { %v277_v61 = vpop.f32.mrf.mxu1 }
  0xc5   :  { %v1391_v15 = vadd.f32 %v277_v61, %v164_v63 }
  0xc7   :  { %635 = vmatmul.f32.gmra.mxu0 %v1391_v15 }
  0xc9   :  { %v1394_v19 = vpop.f32.mrf.mxu2 }
  0xca   :  { %v1396_v59 = vpop.f32.mrf.mxu3 }
  0xcb   :  { %v167_v57 = vpop.f32.mrf.mxu0 }
  0xcc   :  { %v280_v55 = vpop.f32.mrf.mxu1 }
  0xcd   :  { %v1398_v3 = vadd.f32 %v280_v55, %v167_v57 }
  0xcf   :  { %638 = vmatmul.f32.gmra.mxu0 %v1398_v3 }
  0xd1   :  { %v1401_v8 = vpop.f32.mrf.mxu2 }
  0xd2   :  { %v1403_v53 = vpop.f32.mrf.mxu3 }
  0xd3   :  { %v170_v51 = vpop.f32.mrf.mxu0 }
  0xd4   :  { %v283_v49 = vpop.f32.mrf.mxu1 }
  0xd5   :  { %v1405_v61 = vadd.f32 %v283_v49, %v170_v51 }
  0xd7   :  { %641 = vmatmul.f32.gmra.mxu0 %v1405_v61 }
  0xd9   :  { %v1408_v63 = vpop.f32.mrf.mxu2 }
  0xda   :  { %v1410_v47 = vpop.f32.mrf.mxu3 }
  0xdb   :  { %v173_v45 = vpop.f32.mrf.mxu0 }
  0xdc   :  { %v286_v43 = vpop.f32.mrf.mxu1 }
  0xdd   :  { %v1412_v55 = vadd.f32 %v286_v43, %v173_v45 }
  0xdf   :  { %644 = vmatmul.f32.gmra.mxu0 %v1412_v55 }
  0xe1   :  { %v1415_v57 = vpop.f32.mrf.mxu2 }
  0xe2   :  { %v1417_v41 = vpop.f32.mrf.mxu3 }
  0xe3   :  { %v176_v39 = vpop.f32.mrf.mxu0 }
  0xe4   :  { %v289_v37 = vpop.f32.mrf.mxu1 }
  0xe5   :  { %v1419_v49 = vadd.f32 %v289_v37, %v176_v39 }
  0xe7   :  { %647 = vmatmul.f32.gmra.mxu0 %v1419_v49 }
  0xe9   :  { %v1422_v51 = vpop.f32.mrf.mxu2 }
  0xea   :  { %v1424_v35 = vpop.f32.mrf.mxu3 }
  0xeb   :  { %v179_v33 = vpop.f32.mrf.mxu0 }
  0xec   :  { %v292_v6 = vpop.f32.mrf.mxu1 }
  0xed   :  { %v293_v43 = vadd.f32 %v292_v6, %v179_v33 }
  0xef   :  { %650 = vmatmul.f32.gmra.mxu0 %v293_v43 }
  0xf1   :  { %v227_v45 = vpop.f32.mrf.mxu2 }
  0xf2   :  { %v340_v4 = vpop.f32.mrf.mxu3 }
  0xf3   :  { %v182_v26 = vpop.f32.mrf.mxu0 }
  0xf4   :  { %v295_v20 = vpop.f32.mrf.mxu1 }
  0xf5   :  { %v296_v13 = vadd.f32 %v295_v20, %v182_v26 }
  0xf7   :  { %653 = vmatmul.f32.gmra.mxu0 %v296_v13 }
  0xf9   :  { %v230_v11 = vpop.f32.mrf.mxu2 }
  0xfa   :  { %v343_v30 = vpop.f32.mrf.mxu3 }
  0xfb   :  { %v185_v37 = vpop.f32.mrf.mxu0 }
  0xfc   :  { %v298_v39 = vpop.f32.mrf.mxu1 }
  0xfd   :  { %v299_v28 = vadd.f32 %v298_v39, %v185_v37 }
  0xff   :  { %656 = vmatmul.f32.gmra.mxu0 %v299_v28 }
 0x101   :  { %v233_v23 = vpop.f32.mrf.mxu2 }
 0x102   :  { %v346_v21 = vpop.f32.mrf.mxu3 }
 0x103   :  { %v188_v16 = vpop.f32.mrf.mxu0 }
 0x104   :  { %v301_v14 = vpop.f32.mrf.mxu1 }
 0x105   :  { %v302_v9 = vadd.f32 %v301_v14, %v188_v16 }
 0x107   :  { %659 = vmatmul.f32.gmra.mxu0 %v302_v9 }
 0x109   :  { %v236_v33 = vpop.f32.mrf.mxu2 }
 0x10a   :  { %v349_v6 = vpop.f32.mrf.mxu3 }
 0x10b   :  { %v191_v7 = vpop.f32.mrf.mxu0 }
 0x10c   :  { %v304_v2 = vpop.f32.mrf.mxu1 }
 0x10d   :  { %v305_v0 = vadd.f32 %v304_v2, %v191_v7  ;;  %v338_v7 = vadd.f32 %v1424_v35, %v1422_v51  ;;  %v329_v35 = vadd.f32 %v1403_v53, %v1401_v8  ;;  %v1928_v53 = vld [vmem:[#allocation22_spill] sm:$0xff]  ;;  %v726_v8 = vld [vmem:[%s1811_s4 + $0x30] sm:$0xff] }
 0x10e   :  { %v1940_v51 = vld [vmem:[#allocation46_spill] sm:$0xff] }
 0x10f   :  { %662 = vmatmul.f32.gmra.mxu0 %v305_v0 }
 0x111   :  { %v239_v20 = vpop.f32.mrf.mxu2 }
 0x112   :  { %v352_v26 = vpop.f32.mrf.mxu3 }
 0x113   :  { %v194_v62 = vpop.f32.mrf.mxu0 }
 0x114   :  { %v307_v60 = vpop.f32.mrf.mxu1 }
 0x115   :  { %v308_v58 = vadd.f32 %v307_v60, %v194_v62  ;;  %v314_v60 = vadd.f32 %v1368_v31, %v1366_v27  ;;  %v317_v62 = vadd.f32 %v1375_v17, %v1373_v5  ;;  %v332_v17 = vadd.f32 %v1410_v47, %v1408_v63  ;;  %v1934_v31 = vld [vmem:[#allocation34_spill] sm:$0xff]  ;;  %v732_v27 = vld [vmem:[%s1811_s4 + $0x60] sm:$0xff] }
 0x116   :  { %v323_v47 = vadd.f32 %v1389_v1, %v1387_v29  ;;  %v1931_v1 = vld [vmem:[#allocation28_spill] sm:$0xff]  ;;  %v1936_v5 = vld [vmem:[#allocation38_spill] sm:$0xff] }
 0x117   :  { %665 = vmatmul.f32.gmra.mxu0 %v308_v58  ;;  %v729_v29 = vld [vmem:[%s1811_s4 + $0x48] sm:$0xff] }
 0x118   :  { %v725_v63 = vld [vmem:[%s1811_s4 + $0x28] sm:$0xff] }
 0x119   :  { %v242_v37 = vpop.f32.mrf.mxu2 }
 0x11a   :  { %v355_v39 = vpop.f32.mrf.mxu3 }
 0x11b   :  { %v197_v56 = vpop.f32.mrf.mxu0  ;;  %v1429_v2 = vadd.f32 %v355_v39, %v242_v37  ;;  %v1945_v37 = vld [vmem:[#allocation56_spill] sm:$0xff]  ;;  %v1946_v39 = vld [vmem:[#allocation58_spill] sm:$0xff] }
 0x11c   :  { %v310_v54 = vpop.f32.mrf.mxu1 }
 0x11d   :  { %v311_v52 = vadd.f32 %v310_v54, %v197_v56  ;;  %v1434_v54 = vadd.f32 %v352_v26, %v239_v20  ;;  %v347_v56 = vadd.f32 %v346_v21, %v233_v23  ;;  %v320_v21 = vadd.f32 %v1382_v10, %v1380_v25  ;;  %v1933_v23 = vld [vmem:[#allocation32_spill] sm:$0xff]  ;;  %v1944_v26 = vld [vmem:[#allocation54_spill] sm:$0xff] }
 0x11e   :  { %v1943_v20 = vld [vmem:[#allocation52_spill] sm:$0xff] }
 0x11f   :  { %361 = vmatpush.msrb.mxu2 %v311_v52  ;;  %668 = vmatmul.f32.gmra.mxu0 %v311_v52  ;;  %v1437_v52 = vadd.f32 %v349_v6, %v236_v33  ;;  %v720_v33 = vld [vmem:[%s1811_s4] sm:$0xff]  ;;  %v1942_v6 = vld [vmem:[#allocation50_spill] sm:$0xff] }
 0x121   :  { %362 = vmatpush.msrb.mxu2 %v308_v58  ;;  %v245_v14 = vpop.f32.mrf.mxu2  ;;  %v344_v58 = vadd.f32 %v343_v30, %v230_v11  ;;  %v734_v11 = vld [vmem:[%s1811_s4 + $0x70] sm:$0xff] }
 0x122   :  { %v358_v16 = vpop.f32.mrf.mxu3 }
 0x123   :  { %363 = vmatpush.msrb.mxu2 %v305_v0  ;;  %v1426_v50 = vadd.f32 %v358_v16, %v245_v14  ;;  %v341_v0 = vadd.f32 %v340_v4, %v227_v45  ;;  %v731_v4 = vld [vmem:[%s1811_s4 + $0x58] sm:$0xff]  ;;  %v1947_v14 = vld [vmem:[#allocation5_spill] sm:$0xff] }
 0x124   :  { %v1941_v45 = vld [vmem:[#allocation48_spill] sm:$0xff] }
 0x125   :  { %364 = vmatpush.msrb.mxu2 %v302_v9  ;;  %474 = vmatpush.msrb.mxu3 %v1426_v50  ;;  %v335_v9 = vadd.f32 %v1417_v41, %v1415_v57  ;;  %v326_v41 = vadd.f32 %v1396_v59, %v1394_v19  ;;  %v1930_v59 = vld [vmem:[#allocation26_spill] sm:$0xff]  ;;  %v727_v19 = vld [vmem:[%s1811_s4 + $0x38] sm:$0xff] }
 0x127   :  { %365 = vmatpush.msrb.mxu2 %v299_v28  ;;  %475 = vmatpush.msrb.mxu3 %v1429_v2  ;;  %v735_v28 = vld [vmem:[%s1811_s4 + $0x78] sm:$0xff] }
 0x128   :  { %671 = vmatmul.f32.gmra.mxu0 %v314_v60  ;;  %740 = vmatpush.msrb.mxu1 %v735_v28  ;;  %v1958_v28 = vld [vmem:[#allocation19_spill] sm:$0xff] }
 0x129   :  { %366 = vmatpush.msrb.mxu2 %v296_v13  ;;  %476 = vmatpush.msrb.mxu3 %v1434_v54  ;;  %v733_v13 = vld [vmem:[%s1811_s4 + $0x68] sm:$0xff] }
 0x12a   :  { %741 = vmatpush.msrb.mxu1 %v734_v11 }
 0x12b   :  { %367 = vmatpush.msrb.mxu2 %v293_v43  ;;  %477 = vmatpush.msrb.mxu3 %v1437_v52  ;;  %v722_v43 = vld [vmem:[%s1811_s4 + $0x10] sm:$0xff] }
 0x12c   :  { %742 = vmatpush.msrb.mxu1 %v733_v13 }
 0x12d   :  { %368 = vmatpush.msrb.mxu2 %v1419_v49  ;;  %478 = vmatpush.msrb.mxu3 %v347_v56  ;;  %v723_v49 = vld [vmem:[%s1811_s4 + $0x18] sm:$0xff] }
 0x12e   :  { %743 = vmatpush.msrb.mxu1 %v732_v27  ;;  %v1960_v27 = vld [vmem:[#allocation23_spill] sm:$0xff] }
 0x12f   :  { %369 = vmatpush.msrb.mxu2 %v1412_v55  ;;  %479 = vmatpush.msrb.mxu3 %v344_v58  ;;  %v724_v55 = vld [vmem:[%s1811_s4 + $0x20] sm:$0xff] }
 0x130   :  { %674 = vmatmul.f32.gmra.mxu0 %v317_v62  ;;  %744 = vmatpush.msrb.mxu1 %v731_v4  ;;  %v1961_v4 = vld [vmem:[#allocation25_spill] sm:$0xff] }
 0x131   :  { %370 = vmatpush.msrb.mxu2 %v1405_v61  ;;  %480 = vmatpush.msrb.mxu3 %v341_v0  ;;  %v1939_v61 = vld [vmem:[#allocation44_spill] sm:$0xff] }
 0x133   :  { %371 = vmatpush.msrb.mxu2 %v1398_v3  ;;  %481 = vmatpush.msrb.mxu3 %v338_v7  ;;  %v1938_v3 = vld [vmem:[#allocation42_spill] sm:$0xff] }
 0x135   :  { %372 = vmatpush.msrb.mxu2 %v1391_v15  ;;  %482 = vmatpush.msrb.mxu3 %v335_v9  ;;  %v728_v15 = vld [vmem:[%s1811_s4 + $0x40] sm:$0xff] }
 0x137   :  { %373 = vmatpush.msrb.mxu2 %v1384_v24  ;;  %483 = vmatpush.msrb.mxu3 %v332_v17  ;;  %v1937_v24 = vld [vmem:[#allocation40_spill] sm:$0xff] }
 0x138   :  { %677 = vmatmul.f32.gmra.mxu0 %v320_v21 }
 0x139   :  { %374 = vmatpush.msrb.mxu2 %v1377_v18  ;;  %484 = vmatpush.msrb.mxu3 %v329_v35  ;;  %v730_v18 = vld [vmem:[%s1811_s4 + $0x50] sm:$0xff] }
 0x13a   :  { %745 = vmatpush.msrb.mxu1 %v730_v18 }
 0x13b   :  { %375 = vmatpush.msrb.mxu2 %v1370_v22  ;;  %485 = vmatpush.msrb.mxu3 %v326_v41  ;;  %v1932_v22 = vld [vmem:[#allocation30_spill] sm:$0xff] }
 0x13c   :  { %746 = vmatpush.msrb.mxu1 %v729_v29  ;;  %v1962_v29 = vld [vmem:[#allocation27_spill] sm:$0xff] }
 0x13d   :  { %376 = vmatpush.msrb.mxu2 %v1363_v12  ;;  %486 = vmatpush.msrb.mxu3 %v323_v47  ;;  %v1935_v12 = vld [vmem:[#allocation36_spill] sm:$0xff] }
 0x13e   :  { %377 = vmatmul.f32.vlgmr.msrb.gmra.mxu2 %v1123_v32  ;;  %v1472_v32 = vpop.f32.mrf.mxu0  ;;  %747 = vmatpush.msrb.mxu1 %v728_v15  ;;  %v1963_v15 = vld [vmem:[#allocation29_spill] sm:$0xff] }
 0x13f   :  { %487 = vmatpush.msrb.mxu3 %v320_v21  ;;  %v1953_v21 = vld [vmem:[#allocation11_spill] sm:$0xff] }
 0x140   :  { %680 = vmatmul.f32.gmra.mxu0 %v323_v47  ;;  %748 = vmatpush.msrb.mxu1 %v727_v19 }
 0x141   :  { %488 = vmatpush.msrb.mxu3 %v317_v62  ;;  %v1951_v62 = vld [vmem:[#allocation9_spill] sm:$0xff] }
 0x142   :  { %749 = vmatpush.msrb.mxu1 %v726_v8 }
 0x143   :  { %489 = vmatpush.msrb.mxu3 %v314_v60  ;;  %v1949_v60 = vld [vmem:[#allocation7_spill] sm:$0xff] }
 0x144   :  { %490 = vmatmul.f32.vlgmr.msrb.gmra.mxu3 %v1127_v34  ;;  %750 = vmatpush.msrb.mxu1 %v725_v63  ;;  %v1965_v63 = vld [vmem:[#allocation33_spill] sm:$0xff] }
 0x146   :  { %380 = vmatmul.f32.gmra.mxu2 %v1135_v36  ;;  %v1476_v34 = vpop.f32.mrf.mxu0  ;;  %v1924_v36 = vld [vmem:[#allocation14_spill] sm:$0xff]  ;;  %751 = vmatpush.msrb.mxu1 %v724_v55 }
 0x148   :  { %683 = vmatmul.f32.gmra.mxu0 %v326_v41  ;;  %752 = vmatpush.msrb.mxu1 %v723_v49 }
 0x14a   :  { %753 = vmatpush.msrb.mxu1 %v722_v43  ;;  %v1966_v43 = vld [vmem:[#allocation35_spill] sm:$0xff] }
 0x14c   :  { %493 = vmatmul.f32.gmra.mxu3 %v1139_v38  ;;  %v1925_v38 = vld [vmem:[#allocation16_spill] sm:$0xff] }
 0x14e   :  { %383 = vmatmul.f32.gmra.mxu2 %v1147_v40  ;;  %v1926_v40 = vld [vmem:[#allocation18_spill] sm:$0xff] }
 0x150   :  { %686 = vmatmul.f32.gmra.mxu0 %v329_v35 }
 0x154   :  { %496 = vmatmul.f32.gmra.mxu3 %v1151_v42  ;;  %v1481_v42 = vpop.f32.mrf.mxu0 }
 0x156   :  { %386 = vmatmul.f32.gmra.mxu2 %v1159_v44  ;;  %v1927_v44 = vld [vmem:[#allocation20_spill] sm:$0xff] }
 0x158   :  { %689 = vmatmul.f32.gmra.mxu0 %v332_v17  ;;  %v1952_v17 = vld [vmem:[#allocation10_spill] sm:$0xff] }
 0x15c   :  { %499 = vmatmul.f32.gmra.mxu3 %v1163_v46  ;;  %v1929_v46 = vld [vmem:[#allocation24_spill] sm:$0xff] }
 0x15e   :  { %389 = vmatmul.f32.gmra.mxu2 %v1171_v48  ;;  %v1486_v48 = vpop.f32.mrf.mxu0 }
 0x160   :  { %692 = vmatmul.f32.gmra.mxu0 %v335_v9 }
 0x164   :  { %502 = vmatmul.f32.gmra.mxu3 %v1924_v36  ;;  %v1954_v36 = vld [vmem:[#allocation12_spill] sm:$0xff] }
 0x166   :  { %392 = vmatmul.f32.gmra.mxu2 %v1925_v38  ;;  %v1490_v10 = vpop.f32.mrf.mxu0  ;;  %v1955_v38 = vld [vmem:[#allocation13_spill] sm:$0xff] }
 0x168   :  { %695 = vmatmul.f32.gmra.mxu0 %v338_v7 }
 0x16c   :  { %505 = vmatmul.f32.gmra.mxu3 %v1926_v40 }
 0x16e   :  { %395 = vmatmul.f32.gmra.mxu2 %v1927_v44  ;;  %v1498_v30 = vpop.f32.mrf.mxu0 }
 0x170   :  { %698 = vmatmul.f32.gmra.mxu0 %v341_v0 }
 0x174   :  { %508 = vmatmul.f32.gmra.mxu3 %v1928_v53 }
 0x176   :  { %398 = vmatmul.f32.gmra.mxu2 %v1929_v46  ;;  %v1519_v25 = vpop.f32.mrf.mxu0  ;;  %v1956_v46 = vld [vmem:[#allocation15_spill] sm:$0xff] }
 0x178   :  { %701 = vmatmul.f32.gmra.mxu0 %v344_v58  ;;  %v1950_v58 = vld [vmem:[#allocation8_spill] sm:$0xff] }
 0x17c   :  { %511 = vmatmul.f32.gmra.mxu3 %v1930_v59  ;;  %v1957_v59 = vld [vmem:[#allocation17_spill] sm:$0xff] }
 0x17e   :  { %401 = vmatmul.f32.gmra.mxu2 %v1931_v1  ;;  %v1543_v57 = vpop.f32.mrf.mxu0 }
 0x180   :  { %704 = vmatmul.f32.gmra.mxu0 %v347_v56 }
 0x184   :  { %514 = vmatmul.f32.gmra.mxu3 %v1932_v22 }
 0x186   :  { %404 = vmatmul.f32.gmra.mxu2 %v1933_v23 }
 0x188   :  { %707 = vmatmul.f32.gmra.mxu0 %v1437_v52 }
 0x18c   :  { %517 = vmatmul.f32.gmra.mxu3 %v1934_v31  ;;  %v1959_v31 = vld [vmem:[#allocation21_spill] sm:$0xff] }
 0x18e   :  { %407 = vmatmul.f32.gmra.mxu2 %v1935_v12 }
 0x190   :  { %710 = vmatmul.f32.gmra.mxu0 %v1434_v54 }
 0x194   :  { %520 = vmatmul.f32.gmra.mxu3 %v1936_v5 }
 0x196   :  { %410 = vmatmul.f32.gmra.mxu2 %v1937_v24 }
 0x198   :  { %713 = vmatmul.f32.gmra.mxu0 %v1429_v2  ;;  %v1948_v2 = vld [vmem:[#allocation6_spill] sm:$0xff] }
 0x19c   :  { %523 = vmatmul.f32.gmra.mxu3 %v1938_v3 }
 0x19e   :  { %413 = vmatmul.f32.gmra.mxu2 %v1939_v61  ;;  %v1964_v61 = vld [vmem:[#allocation31_spill] sm:$0xff] }
 0x1a0   :  { %716 = vmatmul.f32.gmra.mxu0 %v1426_v50  ;;  %v721_v50 = vld [vmem:[%s1811_s4 + $0x8] sm:$0xff] }
 0x1a1   :  { %754 = vmatpush.msrb.mxu1 %v721_v50 }
 0x1a3   :  { %755 = vmatpush.msrb.mxu1 %v720_v33 }
 0x1a4   :  { %526 = vmatmul.f32.gmra.mxu3 %v1940_v51 }
 0x1a6   :  { %416 = vmatmul.f32.gmra.mxu2 %v1941_v45  ;;  %v1967_v45 = vld [vmem:[#allocation37_spill] sm:$0xff] }
 0x1ac   :  { %529 = vmatmul.f32.gmra.mxu3 %v1942_v6 }
 0x1ae   :  { %419 = vmatmul.f32.gmra.mxu2 %v1943_v20  ;;  %v1968_v20 = vld [vmem:[#allocation39_spill] sm:$0xff] }
 0x1b4   :  { %532 = vmatmul.f32.gmra.mxu3 %v1944_v26  ;;  %v1969_v26 = vld [vmem:[#allocation41_spill] sm:$0xff] }
 0x1b6   :  { %422 = vmatmul.f32.gmra.mxu2 %v1945_v37 }
 0x1bc   :  { %535 = vmatmul.f32.gmra.mxu3 %v1946_v39 }
 0x1be   :  { %425 = vmatmul.f32.gmra.mxu2 %v1947_v14 }
 0x1c1   :  { %v378_v16 = vpop.f32.mrf.mxu2 }
 0x1c4   :  { %538 = vmatmul.f32.gmra.mxu3 %v1948_v2  ;;  %v1971_v2 = vld [vmem:[#allocation45_spill] sm:$0xff] }
 0x1c6   :  { %428 = vmatmul.f32.gmra.mxu2 %v1949_v60 }
 0x1c7   :  { %v491_v54 = vpop.f32.mrf.mxu3 }
 0x1c8   :  { %v492_v52 = vadd.f32 %v491_v54, %v378_v16  ;;  %v1970_v16 = vld [vmem:[#allocation43_spill] sm:$0xff] }
 0x1c9   :  { %v381_v56 = vpop.f32.mrf.mxu2 }
 0x1ca   :  { %756 = vmatmul.f32.vlgmr.msrb.gmra.mxu1 %v492_v52 }
 0x1cc   :  { %541 = vmatmul.f32.gmra.mxu3 %v1950_v58  ;;  %v1973_v58 = vld [vmem:[#allocation49_spill] sm:$0xff] }
 0x1ce   :  { %431 = vmatmul.f32.gmra.mxu2 %v1951_v62 }
 0x1cf   :  { %v494_v0 = vpop.f32.mrf.mxu3 }
 0x1d0   :  { %v495_v7 = vadd.f32 %v494_v0, %v381_v56  ;;  %v1972_v56 = vld [vmem:[#allocation47_spill] sm:$0xff] }
 0x1d1   :  { %v384_v9 = vpop.f32.mrf.mxu2 }
 0x1d2   :  { %759 = vmatmul.f32.gmra.mxu1 %v495_v7 }
 0x1d4   :  { %544 = vmatmul.f32.gmra.mxu3 %v1952_v17  ;;  %v1975_v17 = vld [vmem:[#allocation53_spill] sm:$0xff] }
 0x1d6   :  { %434 = vmatmul.f32.gmra.mxu2 %v1953_v21 }
 0x1d7   :  { %v497_v35 = vpop.f32.mrf.mxu3 }
 0x1d8   :  { %v498_v41 = vadd.f32 %v497_v35, %v384_v9  ;;  %v1974_v9 = vld [vmem:[#allocation51_spill] sm:$0xff] }
 0x1d9   :  { %v387_v47 = vpop.f32.mrf.mxu2 }
 0x1da   :  { %762 = vmatmul.f32.gmra.mxu1 %v498_v41 }
 0x1dc   :  { %547 = vmatmul.f32.gmra.mxu3 %v1954_v36  ;;  %v1977_v36 = vld [vmem:[#allocation57_spill] sm:$0xff] }
 0x1de   :  { %437 = vmatmul.f32.gmra.mxu2 %v1955_v38 }
 0x1df   :  { %v500_v40 = vpop.f32.mrf.mxu3 }
 0x1e0   :  { %v501_v44 = vadd.f32 %v500_v40, %v387_v47  ;;  %v1976_v47 = vld [vmem:[#allocation55_spill] sm:$0xff] }
 0x1e1   :  { %v390_v53 = vpop.f32.mrf.mxu2 }
 0x1e2   :  { %765 = vmatmul.f32.gmra.mxu1 %v501_v44 }
 0x1e4   :  { %550 = vmatmul.f32.gmra.mxu3 %v1956_v46 }
 0x1e6   :  { %440 = vmatmul.f32.gmra.mxu2 %v1957_v59 }
 0x1e7   :  { %v503_v1 = vpop.f32.mrf.mxu3 }
 0x1e8   :  { %v504_v22 = vadd.f32 %v503_v1, %v390_v53  ;;  %v1978_v53 = vld [vmem:[#allocation59_spill] sm:$0xff] }
 0x1e9   :  { %v393_v23 = vpop.f32.mrf.mxu2 }
 0x1ea   :  { %768 = vmatmul.f32.gmra.mxu1 %v504_v22  ;;  %v1600_v22 = vld [vmem:[%s1810_s3] ss:$0 sm:$0xff] }
 0x1ec   :  { %553 = vmatmul.f32.gmra.mxu3 %v1958_v28 }
 0x1ee   :  { %443 = vmatmul.f32.gmra.mxu2 %v1959_v31 }
 0x1ef   :  { %v506_v11 = vpop.f32.mrf.mxu3 }
 0x1f0   :  { %v507_v12 = vadd.f32 %v506_v11, %v393_v23  ;;  %v1605_v23 = vld [vmem:[%s1812_s5] ss:$0 sm:$0xff]  ;;  %v625_v11 = vadd.f32 %v1600_v22, %v1472_v32 }
 0x1f1   :  { %v396_v13 = vpop.f32.mrf.mxu2 }
 0x1f2   :  { %771 = vmatmul.f32.gmra.mxu1 %v507_v12 }
 0x1f4   :  { %556 = vmatmul.f32.gmra.mxu3 %v1960_v27 }
 0x1f6   :  { %446 = vmatmul.f32.gmra.mxu2 %v1961_v4 }
 0x1f7   :  { %v509_v5 = vpop.f32.mrf.mxu3 }
 0x1f8   :  { %v510_v18 = vadd.f32 %v509_v5, %v396_v13 }
 0x1f9   :  { %v399_v24 = vpop.f32.mrf.mxu2 }
 0x1fa   :  { %774 = vmatmul.f32.gmra.mxu1 %v510_v18 }
 0x1fc   :  { %559 = vmatmul.f32.gmra.mxu3 %v1962_v29 }
 0x1fe   :  { %449 = vmatmul.f32.gmra.mxu2 %v1963_v15 }
 0x1ff   :  { %v512_v19 = vpop.f32.mrf.mxu3 }
 0x200   :  { %v513_v3 = vadd.f32 %v512_v19, %v399_v24  ;;  %v628_v24 = vadd.f32 %v1600_v22, %v1476_v34 }
 0x201   :  { %v402_v8 = vpop.f32.mrf.mxu2 }
 0x202   :  { %777 = vmatmul.f32.gmra.mxu1 %v513_v3  ;;  %v648_v3 = vpop.f32.mrf.mxu0 }
 0x204   :  { %562 = vmatmul.f32.gmra.mxu3 %v1964_v61 }
 0x206   :  { %452 = vmatmul.f32.gmra.mxu2 %v1965_v63  ;;  %v631_v63 = vadd.f32 %v1600_v22, %v1481_v42 }
 0x207   :  { %v515_v55 = vpop.f32.mrf.mxu3 }
 0x208   :  { %v516_v49 = vadd.f32 %v515_v55, %v402_v8 }
 0x209   :  { %v405_v51 = vpop.f32.mrf.mxu2 }
 0x20a   :  { %780 = vmatmul.f32.gmra.mxu1 %v516_v49 }
 0x20c   :  { %565 = vmatmul.f32.gmra.mxu3 %v1966_v43 }
 0x20e   :  { %455 = vmatmul.f32.gmra.mxu2 %v1967_v45 }
 0x20f   :  { %v518_v50 = vpop.f32.mrf.mxu3 }
 0x210   :  { %v519_v33 = vadd.f32 %v518_v50, %v405_v51  ;;  %v634_v50 = vadd.f32 %v1600_v22, %v1486_v48 }
 0x211   :  { %v408_v6 = vpop.f32.mrf.mxu2 }
 0x212   :  { %783 = vmatmul.f32.gmra.mxu1 %v519_v33  ;;  %v651_v33 = vpop.f32.mrf.mxu0 }
 0x214   :  { %568 = vmatmul.f32.gmra.mxu3 %v1968_v20 }
 0x216   :  { %458 = vmatmul.f32.gmra.mxu2 %v1969_v26 }
 0x217   :  { %v521_v37 = vpop.f32.mrf.mxu3 }
 0x218   :  { %v522_v39 = vadd.f32 %v521_v37, %v408_v6 }
 0x219   :  { %v411_v14 = vpop.f32.mrf.mxu2 }
 0x21a   :  { %786 = vmatmul.f32.gmra.mxu1 %v522_v39 }
 0x21c   :  { %571 = vmatmul.f32.gmra.mxu3 %v1970_v16 }
 0x21e   :  { %461 = vmatmul.f32.gmra.mxu2 %v1971_v2 }
 0x21f   :  { %v524_v60 = vpop.f32.mrf.mxu3 }
 0x220   :  { %v525_v54 = vadd.f32 %v524_v60, %v411_v14  ;;  %v637_v14 = vadd.f32 %v1600_v22, %v1490_v10  ;;  %v654_v60 = vpop.f32.mrf.mxu0 }
 0x221   :  { %v414_v52 = vpop.f32.mrf.mxu2 }
 0x222   :  { %789 = vmatmul.f32.gmra.mxu1 %v525_v54 }
 0x224   :  { %574 = vmatmul.f32.gmra.mxu3 %v1972_v56 }
 0x226   :  { %464 = vmatmul.f32.gmra.mxu2 %v1973_v58  ;;  %v640_v58 = vadd.f32 %v1600_v22, %v1498_v30 }
 0x227   :  { %v527_v62 = vpop.f32.mrf.mxu3 }
 0x228   :  { %v528_v0 = vadd.f32 %v527_v62, %v414_v52 }
 0x229   :  { %v417_v7 = vpop.f32.mrf.mxu2 }
 0x22a   :  { %792 = vmatmul.f32.gmra.mxu1 %v528_v0 }
 0x22c   :  { %577 = vmatmul.f32.gmra.mxu3 %v1974_v9  ;;  %v657_v9 = vpop.f32.mrf.mxu0 }
 0x22e   :  { %467 = vmatmul.f32.gmra.mxu2 %v1975_v17 }
 0x22f   :  { %v530_v21 = vpop.f32.mrf.mxu3 }
 0x230   :  { %v531_v35 = vadd.f32 %v530_v21, %v417_v7 }
 0x231   :  { %v420_v41 = vpop.f32.mrf.mxu2 }
 0x232   :  { %795 = vmatmul.f32.gmra.mxu1 %v531_v35  ;;  %v643_v35 = vadd.f32 %v1600_v22, %v1519_v25 }
 0x234   :  { %580 = vmatmul.f32.gmra.mxu3 %v1976_v47 }
 0x236   :  { %470 = vmatmul.f32.gmra.mxu2 %v1977_v36 }
 0x237   :  { %v533_v38 = vpop.f32.mrf.mxu3 }
 0x238   :  { %v534_v40 = vadd.f32 %v533_v38, %v420_v41  ;;  %v660_v38 = vpop.f32.mrf.mxu0 }
 0x239   :  { %v423_v44 = vpop.f32.mrf.mxu2 }
 0x23a   :  { %798 = vmatmul.f32.gmra.mxu1 %v534_v40 }
 0x23c   :  { %583 = vmatmul.f32.gmra.mxu3 %v1978_v53  ;;  %v646_v53 = vadd.f32 %v1600_v22, %v1543_v57 }
 0x23f   :  { %v536_v46 = vpop.f32.mrf.mxu3 }
 0x240   :  { %v537_v59 = vadd.f32 %v536_v46, %v423_v44 }
 0x241   :  { %v426_v1 = vpop.f32.mrf.mxu2 }
 0x242   :  { %801 = vmatmul.f32.gmra.mxu1 %v537_v59 }
 0x247   :  { %v539_v28 = vpop.f32.mrf.mxu3  ;;  %v757_v31 = vpop.f32.mrf.mxu1 }
 0x248   :  { %v540_v12 = vadd.f32 %v539_v28, %v426_v1  ;;  %v758_v13 = vadd.f32 %v1605_v23, %v757_v31 }
 0x249   :  { %v429_v27 = vpop.f32.mrf.mxu2 }
 0x24a   :  { %v853_v4 = vadd.f32 %v758_v13, %v625_v11  ;;  %804 = vmatmul.f32.gmra.mxu1 %v540_v12  ;;  %v649_v11 = vadd.f32 %v1600_v22, %v648_v3  ;;  %v663_v12 = vpop.f32.mrf.mxu0 }
 0x24c   :  { %886 = vst.msk [vmem:[%s1813_s6] sm:$0xff] %vm885_vm0, %v853_v4 }
 0x24f   :  { %v542_v5 = vpop.f32.mrf.mxu3  ;;  %v760_v18 = vpop.f32.mrf.mxu1 }
 0x250   :  { %v543_v29 = vadd.f32 %v542_v5, %v429_v27  ;;  %v761_v32 = vadd.f32 %v1605_v23, %v760_v18 }
 0x251   :  { %v432_v15 = vpop.f32.mrf.mxu2 }
 0x252   :  { %v854_v19 = vadd.f32 %v761_v32, %v628_v24  ;;  %807 = vmatmul.f32.gmra.mxu1 %v543_v29  ;;  %v652_v24 = vadd.f32 %v1600_v22, %v651_v33  ;;  %v658_v33 = vadd.f32 %v1600_v22, %v657_v9 }
 0x254   :  { %887 = vst.msk [vmem:[%s1813_s6 + $0x8] sm:$0xff] %vm885_vm0, %v854_v19  ;;  %v666_v19 = vpop.f32.mrf.mxu0 }
 0x257   :  { %v545_v8 = vpop.f32.mrf.mxu3  ;;  %v763_v61 = vpop.f32.mrf.mxu1 }
 0x258   :  { %v546_v55 = vadd.f32 %v545_v8, %v432_v15  ;;  %v764_v34 = vadd.f32 %v1605_v23, %v763_v61 }
 0x259   :  { %v435_v49 = vpop.f32.mrf.mxu2 }
 0x25a   :  { %v855_v51 = vadd.f32 %v764_v34, %v631_v63  ;;  %810 = vmatmul.f32.gmra.mxu1 %v546_v55  ;;  %v655_v63 = vadd.f32 %v1600_v22, %v654_v60 }
 0x25c   :  { %888 = vst.msk [vmem:[%s1813_s6 + $0x10] sm:$0xff] %vm885_vm0, %v855_v51 }
 0x25f   :  { %v548_v43 = vpop.f32.mrf.mxu3  ;;  %v766_v45 = vpop.f32.mrf.mxu1 }
 0x260   :  { %v549_v6 = vadd.f32 %v548_v43, %v435_v49  ;;  %v767_v42 = vadd.f32 %v1605_v23, %v766_v45  ;;  %v669_v43 = vpop.f32.mrf.mxu0 }
 0x261   :  { %v438_v20 = vpop.f32.mrf.mxu2 }
 0x262   :  { %v856_v26 = vadd.f32 %v767_v42, %v634_v50  ;;  %813 = vmatmul.f32.gmra.mxu1 %v549_v6 }
 0x264   :  { %889 = vst.msk [vmem:[%s1813_s6 + $0x18] sm:$0xff] %vm885_vm0, %v856_v26 }
 0x267   :  { %v551_v37 = vpop.f32.mrf.mxu3  ;;  %v769_v39 = vpop.f32.mrf.mxu1 }
 0x268   :  { %v552_v16 = vadd.f32 %v551_v37, %v438_v20  ;;  %v770_v48 = vadd.f32 %v1605_v23, %v769_v39  ;;  %v672_v37 = vpop.f32.mrf.mxu0 }
 0x269   :  { %v441_v2 = vpop.f32.mrf.mxu2 }
 0x26a   :  { %v857_v54 = vadd.f32 %v770_v48, %v637_v14  ;;  %816 = vmatmul.f32.gmra.mxu1 %v552_v16  ;;  %v661_v16 = vadd.f32 %v1600_v22, %v660_v38 }
 0x26c   :  { %890 = vst.msk [vmem:[%s1813_s6 + $0x20] sm:$0xff] %vm885_vm0, %v857_v54 }
 0x26f   :  { %v554_v52 = vpop.f32.mrf.mxu3  ;;  %v772_v56 = vpop.f32.mrf.mxu1 }
 0x270   :  { %v555_v62 = vadd.f32 %v554_v52, %v441_v2  ;;  %v773_v10 = vadd.f32 %v1605_v23, %v772_v56 }
 0x271   :  { %v444_v0 = vpop.f32.mrf.mxu2 }
 0x272   :  { %v858_v7 = vadd.f32 %v773_v10, %v640_v58  ;;  %819 = vmatmul.f32.gmra.mxu1 %v555_v62  ;;  %v664_v58 = vadd.f32 %v1600_v22, %v663_v12 }
 0x274   :  { %891 = vst.msk [vmem:[%s1813_s6 + $0x28] sm:$0xff] %vm885_vm0, %v858_v7 }
 0x277   :  { %v557_v17 = vpop.f32.mrf.mxu3  ;;  %v775_v21 = vpop.f32.mrf.mxu1 }
 0x278   :  { %v558_v41 = vadd.f32 %v557_v17, %v444_v0  ;;  %v776_v30 = vadd.f32 %v1605_v23, %v775_v21  ;;  %v675_v0 = vpop.f32.mrf.mxu0 }
 0x279   :  { %v447_v47 = vpop.f32.mrf.mxu2 }
 0x27a   :  { %v859_v36 = vadd.f32 %v776_v30, %v643_v35  ;;  %822 = vmatmul.f32.gmra.mxu1 %v558_v41  ;;  %v667_v35 = vadd.f32 %v1600_v22, %v666_v19 }
 0x27c   :  { %892 = vst.msk [vmem:[%s1813_s6 + $0x30] sm:$0xff] %vm885_vm0, %v859_v36 }
 0x27f   :  { %v560_v40 = vpop.f32.mrf.mxu3  ;;  %v778_v44 = vpop.f32.mrf.mxu1 }
 0x280   :  { %v561_v46 = vadd.f32 %v560_v40, %v447_v47  ;;  %v779_v25 = vadd.f32 %v1605_v23, %v778_v44  ;;  %v678_v36 = vpop.f32.mrf.mxu0 }
 0x281   :  { %v450_v59 = vpop.f32.mrf.mxu2 }
 0x282   :  { %v860_v1 = vadd.f32 %v779_v25, %v646_v53  ;;  %825 = vmatmul.f32.gmra.mxu1 %v561_v46  ;;  %v670_v53 = vadd.f32 %v1600_v22, %v669_v43 }
 0x284   :  { %893 = vst.msk [vmem:[%s1813_s6 + $0x38] sm:$0xff] %vm885_vm0, %v860_v1 }
 0x287   :  { %v563_v28 = vpop.f32.mrf.mxu3  ;;  %v781_v31 = vpop.f32.mrf.mxu1 }
 0x288   :  { %v564_v13 = vadd.f32 %v563_v28, %v450_v59  ;;  %v782_v27 = vadd.f32 %v1605_v23, %v781_v31  ;;  %v681_v1 = vpop.f32.mrf.mxu0  ;;  %v673_v31 = vadd.f32 %v1600_v22, %v672_v37 }
 0x289   :  { %v453_v57 = vpop.f32.mrf.mxu2 }
 0x28a   :  { %v861_v4 = vadd.f32 %v782_v27, %v649_v11  ;;  %828 = vmatmul.f32.gmra.mxu1 %v564_v13 }
 0x28c   :  { %894 = vst.msk [vmem:[%s1813_s6 + $0x40] sm:$0xff] %vm885_vm0, %v861_v4 }
 0x28f   :  { %v566_v5 = vpop.f32.mrf.mxu3  ;;  %v784_v18 = vpop.f32.mrf.mxu1 }
 0x290   :  { %v567_v29 = vadd.f32 %v566_v5, %v453_v57  ;;  %v785_v32 = vadd.f32 %v1605_v23, %v784_v18  ;;  %v684_v13 = vpop.f32.mrf.mxu0  ;;  %v676_v57 = vadd.f32 %v1600_v22, %v675_v0 }
 0x291   :  { %v456_v15 = vpop.f32.mrf.mxu2 }
 0x292   :  { %v862_v3 = vadd.f32 %v785_v32, %v652_v24  ;;  %831 = vmatmul.f32.gmra.mxu1 %v567_v29  ;;  %v679_v24 = vadd.f32 %v1600_v22, %v678_v36 }
 0x294   :  { %895 = vst.msk [vmem:[%s1813_s6 + $0x48] sm:$0xff] %vm885_vm0, %v862_v3  ;;  %v682_v3 = vadd.f32 %v1600_v22, %v681_v1 }
 0x297   :  { %v569_v8 = vpop.f32.mrf.mxu3  ;;  %v787_v61 = vpop.f32.mrf.mxu1 }
 0x298   :  { %v570_v55 = vadd.f32 %v569_v8, %v456_v15  ;;  %v788_v34 = vadd.f32 %v1605_v23, %v787_v61  ;;  %v687_v32 = vpop.f32.mrf.mxu0 }
 0x299   :  { %v459_v49 = vpop.f32.mrf.mxu2 }
 0x29a   :  { %v863_v51 = vadd.f32 %v788_v34, %v655_v63  ;;  %834 = vmatmul.f32.gmra.mxu1 %v570_v55  ;;  %v685_v34 = vadd.f32 %v1600_v22, %v684_v13 }
 0x29c   :  { %896 = vst.msk [vmem:[%s1813_s6 + $0x50] sm:$0xff] %vm885_vm0, %v863_v51 }
 0x29f   :  { %v572_v45 = vpop.f32.mrf.mxu3  ;;  %v790_v50 = vpop.f32.mrf.mxu1 }
 0x2a0   :  { %v573_v6 = vadd.f32 %v572_v45, %v459_v49  ;;  %v791_v42 = vadd.f32 %v1605_v23, %v790_v50  ;;  %v690_v63 = vpop.f32.mrf.mxu0  ;;  %v688_v50 = vadd.f32 %v1600_v22, %v687_v32 }
 0x2a1   :  { %v462_v20 = vpop.f32.mrf.mxu2 }
 0x2a2   :  { %v864_v26 = vadd.f32 %v791_v42, %v658_v33  ;;  %837 = vmatmul.f32.gmra.mxu1 %v573_v6 }
 0x2a4   :  { %897 = vst.msk [vmem:[%s1813_s6 + $0x58] sm:$0xff] %vm885_vm0, %v864_v26  ;;  %v691_v26 = vadd.f32 %v1600_v22, %v690_v63 }
 0x2a7   :  { %v575_v39 = vpop.f32.mrf.mxu3  ;;  %v793_v14 = vpop.f32.mrf.mxu1 }
 0x2a8   :  { %v576_v48 = vadd.f32 %v575_v39, %v462_v20  ;;  %v794_v2 = vadd.f32 %v1605_v23, %v793_v14  ;;  %v693_v43 = vpop.f32.mrf.mxu0 }
 0x2a9   :  { %v465_v60 = vpop.f32.mrf.mxu2 }
 0x2aa   :  { %v865_v54 = vadd.f32 %v794_v2, %v661_v16  ;;  %840 = vmatmul.f32.gmra.mxu1 %v576_v48  ;;  %v694_v16 = vadd.f32 %v1600_v22, %v693_v43 }
 0x2ac   :  { %898 = vst.msk [vmem:[%s1813_s6 + $0x60] sm:$0xff] %vm885_vm0, %v865_v54 }
 0x2af   :  { %v578_v52 = vpop.f32.mrf.mxu3  ;;  %v796_v56 = vpop.f32.mrf.mxu1 }
 0x2b0   :  { %v579_v62 = vadd.f32 %v578_v52, %v465_v60  ;;  %v797_v10 = vadd.f32 %v1605_v23, %v796_v56  ;;  %v696_v42 = vpop.f32.mrf.mxu0 }
 0x2b1   :  { %v468_v9 = vpop.f32.mrf.mxu2  ;;  %v697_v52 = vadd.f32 %v1600_v22, %v696_v42 }
 0x2b2   :  { %v866_v7 = vadd.f32 %v797_v10, %v664_v58  ;;  %843 = vmatmul.f32.gmra.mxu1 %v579_v62 }
 0x2b4   :  { %899 = vst.msk [vmem:[%s1813_s6 + $0x68] sm:$0xff] %vm885_vm0, %v866_v7 }
 0x2b7   :  { %v581_v17 = vpop.f32.mrf.mxu3  ;;  %v799_v21 = vpop.f32.mrf.mxu1 }
 0x2b8   :  { %v582_v41 = vadd.f32 %v581_v17, %v468_v9  ;;  %v800_v30 = vadd.f32 %v1605_v23, %v799_v21  ;;  %v699_v2 = vpop.f32.mrf.mxu0 }
 0x2b9   :  { %v471_v38 = vpop.f32.mrf.mxu2  ;;  %v700_v0 = vadd.f32 %v1600_v22, %v699_v2 }
 0x2ba   :  { %v867_v47 = vadd.f32 %v800_v30, %v667_v35  ;;  %846 = vmatmul.f32.gmra.mxu1 %v582_v41 }
 0x2bc   :  { %900 = vst.msk [vmem:[%s1813_s6 + $0x70] sm:$0xff] %vm885_vm0, %v867_v47 }
 0x2bf   :  { %v584_v40 = vpop.f32.mrf.mxu3  ;;  %v802_v44 = vpop.f32.mrf.mxu1 }
 0x2c0   :  { %v585_v46 = vadd.f32 %v584_v40, %v471_v38  ;;  %v803_v25 = vadd.f32 %v1605_v23, %v802_v44  ;;  %v702_v62 = vpop.f32.mrf.mxu0 }
 0x2c1   :  { %v703_v35 = vadd.f32 %v1600_v22, %v702_v62 }
 0x2c2   :  { %v868_v59 = vadd.f32 %v803_v25, %v670_v53  ;;  %849 = vmatmul.f32.gmra.mxu1 %v585_v46 }
 0x2c4   :  { %901 = vst.msk [vmem:[%s1813_s6 + $0x78] sm:$0xff] %vm885_vm0, %v868_v59 }
 0x2c7   :  { %v805_v28 = vpop.f32.mrf.mxu1 }
 0x2c8   :  { %v806_v11 = vadd.f32 %v1605_v23, %v805_v28  ;;  %v705_v17 = vpop.f32.mrf.mxu0 }
 0x2c9   :  { %v706_v38 = vadd.f32 %v1600_v22, %v705_v17 }
 0x2ca   :  { %v869_v12 = vadd.f32 %v806_v11, %v673_v31 }
 0x2cc   :  { %902 = vst.msk [vmem:[%s1813_s6 + $0x80] sm:$0xff] %vm885_vm0, %v869_v12 }
 0x2cf   :  { %v808_v27 = vpop.f32.mrf.mxu1 }
 0x2d0   :  { %v809_v4 = vadd.f32 %v1605_v23, %v808_v27  ;;  %v708_v47 = vpop.f32.mrf.mxu0 }
 0x2d1   :  { %v709_v46 = vadd.f32 %v1600_v22, %v708_v47 }
 0x2d2   :  { %v870_v5 = vadd.f32 %v809_v4, %v676_v57 }
 0x2d4   :  { %903 = vst.msk [vmem:[%s1813_s6 + $0x88] sm:$0xff] %vm885_vm0, %v870_v5 }
 0x2d7   :  { %v811_v18 = vpop.f32.mrf.mxu1 }
 0x2d8   :  { %v812_v29 = vadd.f32 %v1605_v23, %v811_v18  ;;  %v711_v59 = vpop.f32.mrf.mxu0 }
 0x2d9   :  { %v712_v31 = vadd.f32 %v1600_v22, %v711_v59 }
 0x2da   :  { %v871_v15 = vadd.f32 %v812_v29, %v679_v24 }
 0x2dc   :  { %904 = vst.msk [vmem:[%s1813_s6 + $0x90] sm:$0xff] %vm885_vm0, %v871_v15 }
 0x2df   :  { %v814_v19 = vpop.f32.mrf.mxu1 }
 0x2e0   :  { %v815_v8 = vadd.f32 %v1605_v23, %v814_v19  ;;  %v714_v13 = vpop.f32.mrf.mxu0 }
 0x2e1   :  { %v715_v57 = vadd.f32 %v1600_v22, %v714_v13 }
 0x2e2   :  { %v872_v61 = vadd.f32 %v815_v8, %v682_v3 }
 0x2e4   :  { %905 = vst.msk [vmem:[%s1813_s6 + $0x98] sm:$0xff] %vm885_vm0, %v872_v61 }
 0x2e7   :  { %v817_v55 = vpop.f32.mrf.mxu1 }
 0x2e8   :  { %v818_v49 = vadd.f32 %v1605_v23, %v817_v55  ;;  %v717_v18 = vpop.f32.mrf.mxu0 }
 0x2e9   :  { %v718_v29 = vadd.f32 %v1600_v22, %v717_v18 }
 0x2ea   :  { %v873_v51 = vadd.f32 %v818_v49, %v685_v34 }
 0x2ec   :  { %906 = vst.msk [vmem:[%s1813_s6 + $0xa0] sm:$0xff] %vm885_vm0, %v873_v51 }
 0x2ef   :  { %v820_v45 = vpop.f32.mrf.mxu1 }
 0x2f0   :  { %v821_v33 = vadd.f32 %v1605_v23, %v820_v45 }
 0x2f2   :  { %v874_v6 = vadd.f32 %v821_v33, %v688_v50 }
 0x2f4   :  { %907 = vst.msk [vmem:[%s1813_s6 + $0xa8] sm:$0xff] %vm885_vm0, %v874_v6 }
 0x2f7   :  { %v823_v20 = vpop.f32.mrf.mxu1 }
 0x2f8   :  { %v824_v37 = vadd.f32 %v1605_v23, %v823_v20 }
 0x2fa   :  { %v875_v39 = vadd.f32 %v824_v37, %v691_v26 }
 0x2fc   :  { %908 = vst.msk [vmem:[%s1813_s6 + $0xb0] sm:$0xff] %vm885_vm0, %v875_v39 }
 0x2ff   :  { %v826_v14 = vpop.f32.mrf.mxu1 }
 0x300   :  { %v827_v48 = vadd.f32 %v1605_v23, %v826_v14 }
 0x302   :  { %v876_v60 = vadd.f32 %v827_v48, %v694_v16 }
 0x304   :  { %909 = vst.msk [vmem:[%s1813_s6 + $0xb8] sm:$0xff] %vm885_vm0, %v876_v60 }
 0x307   :  { %v829_v54 = vpop.f32.mrf.mxu1 }
 0x308   :  { %v830_v56 = vadd.f32 %v1605_v23, %v829_v54 }
 0x30a   :  { %v877_v58 = vadd.f32 %v830_v56, %v697_v52 }
 0x30c   :  { %910 = vst.msk [vmem:[%s1813_s6 + $0xc0] sm:$0xff] %vm885_vm0, %v877_v58 }
 0x30f   :  { %v832_v10 = vpop.f32.mrf.mxu1 }
 0x310   :  { %v833_v7 = vadd.f32 %v1605_v23, %v832_v10 }
 0x312   :  { %v878_v9 = vadd.f32 %v833_v7, %v700_v0 }
 0x314   :  { %911 = vst.msk [vmem:[%s1813_s6 + $0xc8] sm:$0xff] %vm885_vm0, %v878_v9 }
 0x317   :  { %v835_v21 = vpop.f32.mrf.mxu1 }
 0x318   :  { %v836_v41 = vadd.f32 %v1605_v23, %v835_v21 }
 0x31a   :  { %v879_v30 = vadd.f32 %v836_v41, %v703_v35 }
 0x31c   :  { %912 = vst.msk [vmem:[%s1813_s6 + $0xd0] sm:$0xff] %vm885_vm0, %v879_v30 }
 0x31f   :  { %v838_v36 = vpop.f32.mrf.mxu1 }
 0x320   :  { %v839_v40 = vadd.f32 %v1605_v23, %v838_v36 }
 0x322   :  { %v880_v44 = vadd.f32 %v839_v40, %v706_v38 }
 0x324   :  { %913 = vst.msk [vmem:[%s1813_s6 + $0xd8] sm:$0xff] %vm885_vm0, %v880_v44 }
 0x327   :  { %v841_v53 = vpop.f32.mrf.mxu1 }
 0x328   :  { %v842_v25 = vadd.f32 %v1605_v23, %v841_v53 }
 0x32a   :  { %v881_v1 = vadd.f32 %v842_v25, %v709_v46 }
 0x32c   :  { %914 = vst.msk [vmem:[%s1813_s6 + $0xe0] sm:$0xff] %vm885_vm0, %v881_v1 }
 0x32f   :  { %v844_v28 = vpop.f32.mrf.mxu1 }
 0x330   :  { %v845_v11 = vadd.f32 %v1605_v23, %v844_v28 }
 0x332   :  { %v882_v12 = vadd.f32 %v845_v11, %v712_v31 }
 0x334   :  { %915 = vst.msk [vmem:[%s1813_s6 + $0xe8] sm:$0xff] %vm885_vm0, %v882_v12 }
 0x337   :  { %v847_v27 = vpop.f32.mrf.mxu1 }
 0x338   :  { %v848_v4 = vadd.f32 %v1605_v23, %v847_v27 }
 0x33a   :  { %v883_v5 = vadd.f32 %v848_v4, %v715_v57 }
 0x33c   :  { %916 = vst.msk [vmem:[%s1813_s6 + $0xf0] sm:$0xff] %vm885_vm0, %v883_v5 }
 0x33f   :  { %v850_v24 = vpop.f32.mrf.mxu1 }
 0x340   :  { %v851_v32 = vadd.f32 %v1605_v23, %v850_v24 }
 0x342   :  { %v884_v15 = vadd.f32 %v851_v32, %v718_v29 }
 0x344   :  { %917 = vst.msk [vmem:[%s1813_s6 + $0xf8] sm:$0xff] %vm885_vm0, %v884_v15 }
 0x345   :  { %922 = vsyncpa [#allocation3], 1 }

</bundles_post_ra>
